<compile_context>
chip_gen: v7x
topology: tpu7x:2x2x1
jax: 0.10.0
libtpu: 0.0.40
codegen_flags: <defaults>
</compile_context>

<pallas_src>
import functools
import math

import jax
import jax.numpy as jnp
from jax.experimental import pallas as pl
from jax.experimental.pallas import tpu as pltpu


# ----------------------------------------------------------------------------
# Small helpers
# ----------------------------------------------------------------------------
def _round_up(x, m):
    return ((x + m - 1) // m) * m


def _row_tile(m):
    for t in (512, 256, 128):
        if m % t == 0:
            return t
    return m  # whole slab in one grid step (block == full array dim)


def _bytes_of(*arrays):
    return int(sum(int(a.size) * jnp.dtype(a.dtype).itemsize for a in arrays))


def _masked_layernorm(x, gamma, beta, d_model, eps):
    # LayerNorm over the first `d_model` lanes of a (rows, D_pad) slab.
    # Padded lanes carry zeros on input and are zeroed on output via gamma/beta=0.
    d_pad = x.shape[-1]
    lane = jax.lax.broadcasted_iota(jnp.int32, (1, d_pad), 1)
    feat = (lane < d_model).astype(jnp.float32)
    inv_d = 1.0 / float(d_model)
    mean = jnp.sum(x * feat, axis=-1, keepdims=True) * inv_d
    diff = (x - mean) * feat
    var = jnp.sum(diff * diff, axis=-1, keepdims=True) * inv_d   # unbiased=False
    xn = (x - mean) * jax.lax.rsqrt(var + eps)
    return gamma * xn + beta


# ----------------------------------------------------------------------------
# Pallas kernels
# ----------------------------------------------------------------------------
def mha_ln_kernel(xq_ref, xkv_ref, m_ref, wq_ref, bq_ref, wkv_ref, bkv_ref,
                  wo_ref, bo_ref, g_ref, beta_ref, o_ref,
                  *, n_head, d_model, eps):
    # xq: (Lq, Dp) f32, xkv: (Lk, Dp) f32, m: (Lq, Lk) f32 {0,1}
    # wq: (Dp, Dp) bf16, wkv: (Dp, 2*Dp) bf16, wo: (Dp, Dp) bf16
    lq, dp = xq_ref.shape
    dk = d_model // n_head
    scale = 1.0 / math.sqrt(dk)

    xq = xq_ref[...]
    xkv = xkv_ref[...]
    m = m_ref[...]

    # fused projections (bf16 MXU inputs, f32 accumulate)
    q = jnp.dot(xq.astype(jnp.bfloat16), wq_ref[...],
                preferred_element_type=jnp.float32) + bq_ref[...]
    kv = jnp.dot(xkv.astype(jnp.bfloat16), wkv_ref[...],
                 preferred_element_type=jnp.float32) + bkv_ref[...]
    k = kv[:, :dp]
    v = kv[:, dp:]

    qb = q.astype(jnp.bfloat16)
    kb = k.astype(jnp.bfloat16)
    vb = v.astype(jnp.bfloat16)

    # per-head scaled-dot-product attention (static head unroll, all in VMEM)
    head_outs = []
    for h in range(n_head):
        lo, hi = h * dk, (h + 1) * dk
        qh = qb[:, lo:hi]
        kh = kb[:, lo:hi]
        vh = vb[:, lo:hi]
        s = jax.lax.dot_general(qh, kh, (((1,), (1,)), ((), ())),
                                preferred_element_type=jnp.float32) * scale
        s = jnp.where(m > 0.0, s, -10000.0)      # masked_fill(mask==0, -10000)
        s = s - jnp.max(s, axis=-1, keepdims=True)
        p = jnp.exp(s)
        p = p * pl.reciprocal(jnp.sum(p, axis=-1, keepdims=True), approx=True)
        head_outs.append(jnp.dot(p.astype(jnp.bfloat16), vh,
                                 preferred_element_type=jnp.float32))
    o_heads = jnp.concatenate(head_outs, axis=-1)          # (Lq, d_model)

    # output projection (only the real d_model rows of wo contribute)
    o = jnp.dot(o_heads.astype(jnp.bfloat16), wo_ref[0:d_model, :],
                preferred_element_type=jnp.float32) + bo_ref[...]

    # residual add + LayerNorm (fused)
    o_ref[...] = _masked_layernorm(o + xq, g_ref[...], beta_ref[...], d_model, eps)


def ffn_ln_kernel(x_ref, w1_ref, b1_ref, w2_ref, b2_ref, g_ref, beta_ref, o_ref,
                  *, d_model, eps):
    # x: (TM, Dp) f32; w1: (Dp, Hp) bf16; w2: (Hp, Dp) bf16
    x = x_ref[...]
    h = jnp.dot(x.astype(jnp.bfloat16), w1_ref[...],
                preferred_element_type=jnp.float32) + b1_ref[...]
    h = jnp.maximum(h, 0.0)
    y = jnp.dot(h.astype(jnp.bfloat16), w2_ref[...],
                preferred_element_type=jnp.float32) + b2_ref[...]
    o_ref[...] = _masked_layernorm(y + x, g_ref[...], beta_ref[...], d_model, eps)


def linear_kernel(x_ref, w_ref, b_ref, o_ref):
    # final vocab projection: (TM, Dp) @ (Dp, Vp) + (1, Vp)
    o_ref[...] = jnp.dot(x_ref[...].astype(jnp.bfloat16), w_ref[...],
                         preferred_element_type=jnp.float32) + b_ref[...]


# ----------------------------------------------------------------------------
# Pallas wrappers
# ----------------------------------------------------------------------------
def pallas_mha_ln(xq, xkv, mask_f, ap, gamma, beta, n_head, d_model, eps=1e-12):
    B, Lq, Dp = xq.shape
    Lk = xkv.shape[1]
    args = (xq, xkv, mask_f, ap["wq"], ap["bq"], ap["wkv"], ap["bkv"],
            ap["wo"], ap["bo"], gamma, beta)
    dk = d_model // n_head
    flops = 2 * B * (Lq * Dp * Dp + Lk * Dp * 2 * Dp
                     + 2 * n_head * Lq * Lk * dk + Lq * d_model * Dp)
    cost = pl.CostEstimate(
        flops=int(flops),
        transcendentals=int(B * (n_head * Lq * Lk + Lq)),
        bytes_accessed=_bytes_of(*args) + int(B * Lq * Dp * 4))
    return pl.pallas_call(
        functools.partial(mha_ln_kernel, n_head=n_head, d_model=d_model, eps=eps),
        out_shape=jax.ShapeDtypeStruct((B, Lq, Dp), jnp.float32),
        grid=(B,),
        in_specs=[
            pl.BlockSpec((None, Lq, Dp), lambda b: (b, 0, 0)),
            pl.BlockSpec((None, Lk, Dp), lambda b: (b, 0, 0)),
            pl.BlockSpec((None, Lq, Lk), lambda b: (b, 0, 0)),
            pl.BlockSpec((Dp, Dp), lambda b: (0, 0)),
            pl.BlockSpec((1, Dp), lambda b: (0, 0)),
            pl.BlockSpec((Dp, 2 * Dp), lambda b: (0, 0)),
            pl.BlockSpec((1, 2 * Dp), lambda b: (0, 0)),
            pl.BlockSpec((Dp, Dp), lambda b: (0, 0)),
            pl.BlockSpec((1, Dp), lambda b: (0, 0)),
            pl.BlockSpec((1, Dp), lambda b: (0, 0)),
            pl.BlockSpec((1, Dp), lambda b: (0, 0)),
        ],
        out_specs=pl.BlockSpec((None, Lq, Dp), lambda b: (b, 0, 0)),
        compiler_params=pltpu.CompilerParams(dimension_semantics=("parallel",)),
        cost_estimate=cost,
    )(*args)


def pallas_ffn_ln(x2d, fp, gamma, beta, d_model, eps=1e-12):
    M, Dp = x2d.shape
    Hp = fp["w1"].shape[1]
    TM = _row_tile(M)
    args = (x2d, fp["w1"], fp["b1"], fp["w2"], fp["b2"], gamma, beta)
    cost = pl.CostEstimate(
        flops=int(4 * M * Dp * Hp),
        transcendentals=int(M),
        bytes_accessed=_bytes_of(*args) + int(M * Dp * 4))
    return pl.pallas_call(
        functools.partial(ffn_ln_kernel, d_model=d_model, eps=eps),
        out_shape=jax.ShapeDtypeStruct((M, Dp), jnp.float32),
        grid=(M // TM,),
        in_specs=[
            pl.BlockSpec((TM, Dp), lambda i: (i, 0)),
            pl.BlockSpec((Dp, Hp), lambda i: (0, 0)),
            pl.BlockSpec((1, Hp), lambda i: (0, 0)),
            pl.BlockSpec((Hp, Dp), lambda i: (0, 0)),
            pl.BlockSpec((1, Dp), lambda i: (0, 0)),
            pl.BlockSpec((1, Dp), lambda i: (0, 0)),
            pl.BlockSpec((1, Dp), lambda i: (0, 0)),
        ],
        out_specs=pl.BlockSpec((TM, Dp), lambda i: (i, 0)),
        compiler_params=pltpu.CompilerParams(dimension_semantics=("parallel",)),
        cost_estimate=cost,
    )(*args)


def pallas_linear(x2d, w, b):
    M, K = x2d.shape
    N = w.shape[1]
    TM = _row_tile(M)
    cost = pl.CostEstimate(
        flops=int(2 * M * K * N),
        transcendentals=0,
        bytes_accessed=_bytes_of(x2d, w, b) + int(M * N * 4))
    return pl.pallas_call(
        linear_kernel,
        out_shape=jax.ShapeDtypeStruct((M, N), jnp.float32),
        grid=(M // TM,),
        in_specs=[
            pl.BlockSpec((TM, K), lambda i: (i, 0)),
            pl.BlockSpec((K, N), lambda i: (0, 0)),
            pl.BlockSpec((1, N), lambda i: (0, 0)),
        ],
        out_specs=pl.BlockSpec((TM, N), lambda i: (i, 0)),
        compiler_params=pltpu.CompilerParams(dimension_semantics=("parallel",)),
        cost_estimate=cost,
    )(x2d, w, b)


# ----------------------------------------------------------------------------
# Transformer building blocks (glue around the kernels)
# ----------------------------------------------------------------------------
def encoder_layer(lp, x, s_mask_f, n_head, d_model):
    B, L, Dp = x.shape
    x = pallas_mha_ln(x, x, s_mask_f, lp["attn"], lp["ln1_g"], lp["ln1_b"],
                      n_head, d_model)
    x = pallas_ffn_ln(x.reshape(B * L, Dp), lp["ffn"], lp["ln2_g"], lp["ln2_b"],
                      d_model).reshape(B, L, Dp)
    return x


def decoder_layer(lp, x, enc, t_mask_f, s_mask_f, n_head, d_model):
    B, L, Dp = x.shape
    x = pallas_mha_ln(x, x, t_mask_f, lp["self_attn"], lp["ln1_g"], lp["ln1_b"],
                      n_head, d_model)
    x = pallas_mha_ln(x, enc, s_mask_f, lp["cross_attn"], lp["ln2_g"], lp["ln2_b"],
                      n_head, d_model)
    x = pallas_ffn_ln(x.reshape(B * L, Dp), lp["ffn"], lp["ln3_g"], lp["ln3_b"],
                      d_model).reshape(B, L, Dp)
    return x


def positional_encoding(max_len, d_model):
    pos = jnp.arange(max_len, dtype=jnp.float32)[:, None]
    two_i = jnp.arange(0, d_model, 2, dtype=jnp.float32)
    div = jnp.power(10000.0, two_i / float(d_model))
    pe = jnp.zeros((max_len, d_model), jnp.float32)
    pe = pe.at[:, 0::2].set(jnp.sin(pos / div))
    pe = pe.at[:, 1::2].set(jnp.cos(pos / div))
    return pe


def make_pad_mask(q_tok, k_tok, pad_idx):
    # (B, Lq, Lk) bool (head dim handled per-batch inside the kernel)
    k_m = (k_tok != pad_idx)[:, None, :]
    q_m = (q_tok != pad_idx)[:, :, None]
    return jnp.logical_and(k_m, q_m)


def make_no_peak_mask(len_q, len_k):
    return jnp.tril(jnp.ones((len_q, len_k), jnp.bool_))


def transformer_forward(pp, src, trg, cfg):
    pad = cfg["src_pad_idx"]
    n_head = cfg["n_head"]
    d_model = cfg["d_model"]
    B, Ls = src.shape
    Lt = trg.shape[1]
    Dp = pp["enc_emb"].shape[1]

    src_mask_f = make_pad_mask(src, src, pad).astype(jnp.float32)
    src_trg_mask_f = make_pad_mask(trg, src, pad).astype(jnp.float32)
    trg_mask_f = jnp.logical_and(make_pad_mask(trg, trg, pad),
                                 make_no_peak_mask(Lt, Lt)[None]).astype(jnp.float32)

    pe = positional_encoding(cfg["max_len"], d_model)
    pe = jnp.pad(pe, ((0, 0), (0, Dp - d_model)))

    # ---- encoder ----  (dropout = identity, eval mode)
    x = pp["enc_emb"][src] + pe[None, :Ls, :]
    for lp in pp["enc_layers"]:
        x = encoder_layer(lp, x, src_mask_f, n_head, d_model)
    enc_src = x

    # ---- decoder ----
    y = pp["dec_emb"][trg] + pe[None, :Lt, :]
    for lp in pp["dec_layers"]:
        y = decoder_layer(lp, y, enc_src, trg_mask_f, src_trg_mask_f, n_head, d_model)

    logits = pallas_linear(y.reshape(B * Lt, Dp), pp["out_w"], pp["out_b"])
    return logits.reshape(B, Lt, -1)[:, :, : cfg["dec_voc_size"]]


# ----------------------------------------------------------------------------
# Parameter init (logical shapes) + padding / fusing / bf16 prep
# ----------------------------------------------------------------------------
def init_params(key, cfg):
    keys = iter(jax.random.split(key, 512))

    def nrm(shape, scale=0.02):
        return jax.random.normal(next(keys), shape, jnp.float32) * scale

    def linear_p(din, dout):
        return nrm((din, dout)), jnp.zeros((1, dout), jnp.float32)

    def mha_p(d):
        wq, bq = linear_p(d, d)
        wk, bk = linear_p(d, d)
        wv, bv = linear_p(d, d)
        wo, bo = linear_p(d, d)
        return dict(wq=wq, bq=bq, wk=wk, bk=bk, wv=wv, bv=bv, wo=wo, bo=bo)

    def ffn_p(d, h):
        w1, b1 = linear_p(d, h)
        w2, b2 = linear_p(h, d)
        return dict(w1=w1, b1=b1, w2=w2, b2=b2)

    d, h = cfg["d_model"], cfg["d_hid"]

    def ln_p():
        return jnp.ones((1, d), jnp.float32), jnp.zeros((1, d), jnp.float32)

    def enc_layer_p():
        g1, b1 = ln_p()
        g2, b2 = ln_p()
        return dict(attn=mha_p(d), ffn=ffn_p(d, h),
                    ln1_g=g1, ln1_b=b1, ln2_g=g2, ln2_b=b2)

    def dec_layer_p():
        g1, b1 = ln_p()
        g2, b2 = ln_p()
        g3, b3 = ln_p()
        return dict(self_attn=mha_p(d), cross_attn=mha_p(d), ffn=ffn_p(d, h),
                    ln1_g=g1, ln1_b=b1, ln2_g=g2, ln2_b=b2, ln3_g=g3, ln3_b=b3)

    enc_emb = nrm((cfg["enc_voc_size"], d), 1.0).at[1].set(0.0)   # padding_idx=1
    dec_emb = nrm((cfg["dec_voc_size"], d), 1.0).at[1].set(0.0)
    out_w, out_b = linear_p(d, cfg["dec_voc_size"])

    return dict(enc_emb=enc_emb, dec_emb=dec_emb,
                enc_layers=[enc_layer_p() for _ in range(cfg["n_layers"])],
                dec_layers=[dec_layer_p() for _ in range(cfg["n_layers"])],
                out_w=out_w, out_b=out_b)


def prepare_params(params, cfg):
    """Zero-pad to 128-multiple lane dims, fuse K/V weights, cast weights to bf16."""
    D = cfg["d_model"]
    Dp = _round_up(D, 128)
    Hp = _round_up(cfg["d_hid"], 128)
    Vp = _round_up(cfg["dec_voc_size"], 128)

    def pad2(a, rows, cols, dtype=None):
        out = jnp.zeros((rows, cols), a.dtype).at[: a.shape[0], : a.shape[1]].set(a)
        return out if dtype is None else out.astype(dtype)

    def prep_mha(p):
        return dict(
            wq=pad2(p["wq"], Dp, Dp, jnp.bfloat16),
            bq=pad2(p["bq"], 1, Dp),
            wkv=jnp.concatenate([pad2(p["wk"], Dp, Dp, jnp.bfloat16),
                                 pad2(p["wv"], Dp, Dp, jnp.bfloat16)], axis=1),
            bkv=jnp.concatenate([pad2(p["bk"], 1, Dp), pad2(p["bv"], 1, Dp)], axis=1),
            wo=pad2(p["wo"], Dp, Dp, jnp.bfloat16),
            bo=pad2(p["bo"], 1, Dp),
        )

    def prep_ffn(p):
        return dict(w1=pad2(p["w1"], Dp, Hp, jnp.bfloat16), b1=pad2(p["b1"], 1, Hp),
                    w2=pad2(p["w2"], Hp, Dp, jnp.bfloat16), b2=pad2(p["b2"], 1, Dp))

    def prep_enc(lp):
        return dict(attn=prep_mha(lp["attn"]), ffn=prep_ffn(lp["ffn"]),
                    ln1_g=pad2(lp["ln1_g"], 1, Dp), ln1_b=pad2(lp["ln1_b"], 1, Dp),
                    ln2_g=pad2(lp["ln2_g"], 1, Dp), ln2_b=pad2(lp["ln2_b"], 1, Dp))

    def prep_dec(lp):
        return dict(self_attn=prep_mha(lp["self_attn"]),
                    cross_attn=prep_mha(lp["cross_attn"]), ffn=prep_ffn(lp["ffn"]),
                    ln1_g=pad2(lp["ln1_g"], 1, Dp), ln1_b=pad2(lp["ln1_b"], 1, Dp),
                    ln2_g=pad2(lp["ln2_g"], 1, Dp), ln2_b=pad2(lp["ln2_b"], 1, Dp),
                    ln3_g=pad2(lp["ln3_g"], 1, Dp), ln3_b=pad2(lp["ln3_b"], 1, Dp))

    return dict(
        enc_emb=pad2(params["enc_emb"], params["enc_emb"].shape[0], Dp),
        dec_emb=pad2(params["dec_emb"], params["dec_emb"].shape[0], Dp),
        enc_layers=[prep_enc(lp) for lp in params["enc_layers"]],
        dec_layers=[prep_dec(lp) for lp in params["dec_layers"]],
        out_w=pad2(params["out_w"], Dp, Vp, jnp.bfloat16),
        out_b=pad2(params["out_b"], 1, Vp),
    )


# ----------------------------------------------------------------------------
if __name__ == "__main__":
    cfg = dict(
        src_pad_idx=1, trg_pad_idx=1, trg_sos_idx=2,
        enc_voc_size=32, dec_voc_size=48,
        d_model=32, n_head=4, max_len=16, d_hid=64,
        n_layers=2, dropout=0.1,
    )
    B, Ls, Lt = 2, 8, 8

    key = jax.random.PRNGKey(0)
    kp, ks, kt = jax.random.split(key, 3)

    raw_params = init_params(kp, cfg)
    params = prepare_params(raw_params, cfg)

    src = jax.random.randint(ks, (B, Ls), 3, cfg["enc_voc_size"], dtype=jnp.int32)
    trg = jax.random.randint(kt, (B, Lt), 3, cfg["dec_voc_size"], dtype=jnp.int32)
    # add some padding tokens so the pad masks are exercised
    src = src.at[0, -2:].set(cfg["src_pad_idx"])
    trg = trg.at[1, -3:].set(cfg["trg_pad_idx"])
    trg = trg.at[:, 0].set(cfg["trg_sos_idx"])

    fwd = jax.jit(lambda p, s, t: transformer_forward(p, s, t, cfg))
    out = fwd(params, src, trg)
    out = jax.block_until_ready(out)

    assert out.shape == (B, Lt, cfg["dec_voc_size"])
    assert bool(jnp.all(jnp.isfinite(out)))
    print("KERNEL_OK")
</pallas_src>

<mosaic_0001>
module attributes {stable_mosaic.version = 11 : i64} {
  func.func @linear_kernel(%arg0: i32, %arg1: memref<16x128xf32, #tpu.memory_space<vmem>>, %arg2: memref<128x128xbf16, #tpu.memory_space<vmem>>, %arg3: memref<1x128xf32, #tpu.memory_space<vmem>>, %arg4: memref<16x128xf32, #tpu.memory_space<vmem>>) attributes {dimension_semantics = [#tpu.dimension_semantics<parallel>], iteration_bounds = array<i64: 1>, scalar_prefetch = 0 : i64, scratch_operands = 0 : i64, tpu.core_type = #tpu.core_type<tc>, window_params = [{transform_indices = @transform_0, window_bounds = array<i64: 16, 128>}, {pipeline_mode = #tpu.pipeline_mode<synchronous>, transform_indices = @transform_1, window_bounds = array<i64: 128, 128>}, {pipeline_mode = #tpu.pipeline_mode<synchronous>, transform_indices = @transform_2, window_bounds = array<i64: 1, 128>}, {transform_indices = @transform_3, window_bounds = array<i64: 16, 128>}]} {
    %c0 = arith.constant 0 : index
    %c0_0 = arith.constant 0 : index
    %0 = vector.load %arg1[%c0, %c0_0] : memref<16x128xf32, #tpu.memory_space<vmem>>, vector<16x128xf32>
    %1 = arith.truncf %0 : vector<16x128xf32> to vector<16x128xbf16>
    %c0_1 = arith.constant 0 : index
    %c0_2 = arith.constant 0 : index
    %2 = vector.load %arg2[%c0_1, %c0_2] : memref<128x128xbf16, #tpu.memory_space<vmem>>, vector<128x128xbf16>
    %cst = arith.constant dense<0.000000e+00> : vector<16x128xf32>
    %3 = tpu.matmul %1, %2, %cst {dimension_numbers = #tpu.dot_dimension_numbers<[1], [0], [0], [1], [0, 0, 1, 1], [], []>} : vector<16x128xbf16>, vector<128x128xbf16>, vector<16x128xf32> -> vector<16x128xf32>
    %c0_3 = arith.constant 0 : index
    %c0_4 = arith.constant 0 : index
    %4 = vector.load %arg3[%c0_3, %c0_4] : memref<1x128xf32, #tpu.memory_space<vmem>>, vector<1x128xf32>
    %5 = vector.broadcast %4 : vector<1x128xf32> to vector<16x128xf32>
    %6 = arith.addf %3, %5 : vector<16x128xf32>
    %c0_5 = arith.constant 0 : index
    %c0_6 = arith.constant 0 : index
    %7 = vector.load %arg4[%c0_5, %c0_6] : memref<16x128xf32, #tpu.memory_space<vmem>>, vector<16x128xf32>
    tpu.vector_store %arg4[%c0_5, %c0_6], %6 {strides = array<i32>} : memref<16x128xf32, #tpu.memory_space<vmem>>, vector<16x128xf32>,
    return
  }
  func.func @transform_0(%arg0: i32) -> (i32, i32) {
    %c0_i32 = arith.constant 0 : i32
    %c0_i32_0 = arith.constant 0 : i32
    return %arg0, %c0_i32 : i32, i32
  }
  func.func @transform_1(%arg0: i32) -> (i32, i32) {
    %c0_i32 = arith.constant 0 : i32
    %c0_i32_0 = arith.constant 0 : i32
    %c0_i32_1 = arith.constant 0 : i32
    return %c0_i32, %c0_i32_0 : i32, i32
  }
  func.func @transform_2(%arg0: i32) -> (i32, i32) {
    %c0_i32 = arith.constant 0 : i32
    %c0_i32_0 = arith.constant 0 : i32
    %c0_i32_1 = arith.constant 0 : i32
    return %c0_i32, %c0_i32_0 : i32, i32
  }
  func.func @transform_3(%arg0: i32) -> (i32, i32) {
    %c0_i32 = arith.constant 0 : i32
    %c0_i32_0 = arith.constant 0 : i32
    return %arg0, %c0_i32 : i32, i32
  }
}

module attributes {stable_mosaic.version = 11 : i64} {
  func.func @mha_ln_kernel(%arg0: i32, %arg1: memref<1x8x128xf32, #tpu.memory_space<vmem>>, %arg2: memref<1x8x128xf32, #tpu.memory_space<vmem>>, %arg3: memref<1x8x8xf32, #tpu.memory_space<vmem>>, %arg4: memref<128x128xbf16, #tpu.memory_space<vmem>>, %arg5: memref<1x128xf32, #tpu.memory_space<vmem>>, %arg6: memref<128x256xbf16, #tpu.memory_space<vmem>>, %arg7: memref<1x256xf32, #tpu.memory_space<vmem>>, %arg8: memref<128x128xbf16, #tpu.memory_space<vmem>>, %arg9: memref<1x128xf32, #tpu.memory_space<vmem>>, %arg10: memref<1x128xf32, #tpu.memory_space<vmem>>, %arg11: memref<1x128xf32, #tpu.memory_space<vmem>>, %arg12: memref<1x8x128xf32, #tpu.memory_space<vmem>>) attributes {dimension_semantics = [#tpu.dimension_semantics<parallel>], iteration_bounds = array<i64: 2>, scalar_prefetch = 0 : i64, scratch_operands = 0 : i64, tpu.core_type = #tpu.core_type<tc>, window_params = [{transform_indices = @transform_0, window_bounds = array<i64: 1, 8, 128>}, {transform_indices = @transform_1, window_bounds = array<i64: 1, 8, 128>}, {transform_indices = @transform_2, window_bounds = array<i64: 1, 8, 8>}, {pipeline_mode = #tpu.pipeline_mode<synchronous>, transform_indices = @transform_3, window_bounds = array<i64: 128, 128>}, {pipeline_mode = #tpu.pipeline_mode<synchronous>, transform_indices = @transform_4, window_bounds = array<i64: 1, 128>}, {pipeline_mode = #tpu.pipeline_mode<synchronous>, transform_indices = @transform_5, window_bounds = array<i64: 128, 256>}, {pipeline_mode = #tpu.pipeline_mode<synchronous>, transform_indices = @transform_6, window_bounds = array<i64: 1, 256>}, {pipeline_mode = #tpu.pipeline_mode<synchronous>, transform_indices = @transform_7, window_bounds = array<i64: 128, 128>}, {pipeline_mode = #tpu.pipeline_mode<synchronous>, transform_indices = @transform_8, window_bounds = array<i64: 1, 128>}, {pipeline_mode = #tpu.pipeline_mode<synchronous>, transform_indices = @transform_9, window_bounds = array<i64: 1, 128>}, {pipeline_mode = #tpu.pipeline_mode<synchronous>, transform_indices = @transform_10, window_bounds = array<i64: 1, 128>}, {transform_indices = @transform_11, window_bounds = array<i64: 1, 8, 128>}]} {
    %c0 = arith.constant 0 : index
    %c0_0 = arith.constant 0 : index
    %c0_1 = arith.constant 0 : index
    %0 = vector.load %arg1[%c0, %c0_0, %c0_1] : memref<1x8x128xf32, #tpu.memory_space<vmem>>, vector<1x8x128xf32>
    %1 = vector.shape_cast %0 : vector<1x8x128xf32> to vector<8x128xf32>
    %c0_2 = arith.constant 0 : index
    %c0_3 = arith.constant 0 : index
    %c0_4 = arith.constant 0 : index
    %2 = vector.load %arg2[%c0_2, %c0_3, %c0_4] : memref<1x8x128xf32, #tpu.memory_space<vmem>>, vector<1x8x128xf32>
    %3 = vector.shape_cast %2 : vector<1x8x128xf32> to vector<8x128xf32>
    %c0_5 = arith.constant 0 : index
    %c0_6 = arith.constant 0 : index
    %c0_7 = arith.constant 0 : index
    %4 = vector.load %arg3[%c0_5, %c0_6, %c0_7] : memref<1x8x8xf32, #tpu.memory_space<vmem>>, vector<1x8x8xf32>
    %5 = vector.shape_cast %4 : vector<1x8x8xf32> to vector<8x8xf32>
    %6 = arith.truncf %1 : vector<8x128xf32> to vector<8x128xbf16>
    %c0_8 = arith.constant 0 : index
    %c0_9 = arith.constant 0 : index
    %7 = vector.load %arg4[%c0_8, %c0_9] : memref<128x128xbf16, #tpu.memory_space<vmem>>, vector<128x128xbf16>
    %cst = arith.constant dense<0.000000e+00> : vector<8x128xf32>
    %8 = tpu.matmul %6, %7, %cst {dimension_numbers = #tpu.dot_dimension_numbers<[1], [0], [0], [1], [0, 0, 1, 1], [], []>} : vector<8x128xbf16>, vector<128x128xbf16>, vector<8x128xf32> -> vector<8x128xf32>
    %c0_10 = arith.constant 0 : index
    %c0_11 = arith.constant 0 : index
    %9 = vector.load %arg5[%c0_10, %c0_11] : memref<1x128xf32, #tpu.memory_space<vmem>>, vector<1x128xf32>
    %10 = vector.broadcast %9 : vector<1x128xf32> to vector<8x128xf32>
    %11 = arith.addf %8, %10 : vector<8x128xf32>
    %12 = arith.truncf %3 : vector<8x128xf32> to vector<8x128xbf16>
    %c0_12 = arith.constant 0 : index
    %c0_13 = arith.constant 0 : index
    %13 = vector.load %arg6[%c0_12, %c0_13] : memref<128x256xbf16, #tpu.memory_space<vmem>>, vector<128x256xbf16>
    %cst_14 = arith.constant dense<0.000000e+00> : vector<8x256xf32>
    %14 = tpu.matmul %12, %13, %cst_14 {dimension_numbers = #tpu.dot_dimension_numbers<[1], [0], [0], [1], [0, 0, 1, 1], [], []>} : vector<8x128xbf16>, vector<128x256xbf16>, vector<8x256xf32> -> vector<8x256xf32>
    %c0_15 = arith.constant 0 : index
    %c0_16 = arith.constant 0 : index
    %15 = vector.load %arg7[%c0_15, %c0_16] : memref<1x256xf32, #tpu.memory_space<vmem>>, vector<1x256xf32>
    %16 = vector.broadcast %15 : vector<1x256xf32> to vector<8x256xf32>
    %17 = arith.addf %14, %16 : vector<8x256xf32>
    %18 = vector.extract_strided_slice %17 {offsets = [0, 0], sizes = [8, 128], strides = [1, 1]} : vector<8x256xf32> to vector<8x128xf32>
    %19 = vector.extract_strided_slice %17 {offsets = [0, 128], sizes = [8, 128], strides = [1, 1]} : vector<8x256xf32> to vector<8x128xf32>
    %20 = arith.truncf %11 : vector<8x128xf32> to vector<8x128xbf16>
    %21 = arith.truncf %18 : vector<8x128xf32> to vector<8x128xbf16>
    %22 = arith.truncf %19 : vector<8x128xf32> to vector<8x128xbf16>
    %23 = vector.extract_strided_slice %20 {offsets = [0, 0], sizes = [8, 8], strides = [1, 1]} : vector<8x128xbf16> to vector<8x8xbf16>
    %24 = vector.extract_strided_slice %21 {offsets = [0, 0], sizes = [8, 8], strides = [1, 1]} : vector<8x128xbf16> to vector<8x8xbf16>
    %25 = vector.extract_strided_slice %22 {offsets = [0, 0], sizes = [8, 8], strides = [1, 1]} : vector<8x128xbf16> to vector<8x8xbf16>
    %cst_17 = arith.constant dense<0.000000e+00> : vector<8x8xf32>
    %26 = tpu.matmul %23, %24, %cst_17 {dimension_numbers = #tpu.dot_dimension_numbers<[1], [1], [0], [0], [0, 0, 1, 0], [], []>} : vector<8x8xbf16>, vector<8x8xbf16>, vector<8x8xf32> -> vector<8x8xf32>
    %cst_18 = arith.constant 0.353553385 : f32
    %27 = vector.broadcast %cst_18 : f32 to vector<8x8xf32>
    %28 = arith.mulf %26, %27 : vector<8x8xf32>
    %cst_19 = arith.constant 0.000000e+00 : f32
    %29 = vector.broadcast %cst_19 : f32 to vector<8x8xf32>
    %30 = arith.cmpf ogt, %5, %29 : vector<8x8xf32>
    %cst_20 = arith.constant -1.000000e+04 : f32
    %31 = vector.broadcast %cst_20 : f32 to vector<8x8xf32>
    %32 = arith.select %30, %28, %31 : vector<8x8xi1>, vector<8x8xf32>
    %cst_21 = arith.constant dense<0xFF800000> : vector<8xf32>
    %33 = vector.multi_reduction <maximumf>, %32, %cst_21 [1] : vector<8x8xf32> to vector<8xf32>
    %34 = vector.shape_cast %33 : vector<8xf32> to vector<8x1xf32>
    %35 = vector.broadcast %34 : vector<8x1xf32> to vector<8x8xf32>
    %36 = arith.subf %32, %35 : vector<8x8xf32>
    %37 = math.exp %36 : vector<8x8xf32>
    %cst_22 = arith.constant dense<0.000000e+00> : vector<8xf32>
    %38 = vector.multi_reduction <add>, %37, %cst_22 [1] : vector<8x8xf32> to vector<8xf32>
    %39 = vector.shape_cast %38 : vector<8xf32> to vector<8x1xf32>
    %40 = tpu.reciprocal %39 {approx = true} : vector<8x1xf32> -> vector<8x1xf32>
    %41 = vector.broadcast %40 : vector<8x1xf32> to vector<8x8xf32>
    %42 = arith.mulf %37, %41 : vector<8x8xf32>
    %43 = arith.truncf %42 : vector<8x8xf32> to vector<8x8xbf16>
    %cst_23 = arith.constant dense<0.000000e+00> : vector<8x8xf32>
    %44 = tpu.matmul %43, %25, %cst_23 {dimension_numbers = #tpu.dot_dimension_numbers<[1], [0], [0], [1], [0, 0, 1, 1], [], []>} : vector<8x8xbf16>, vector<8x8xbf16>, vector<8x8xf32> -> vector<8x8xf32>
    %45 = vector.extract_strided_slice %20 {offsets = [0, 8], sizes = [8, 8], strides = [1, 1]} : vector<8x128xbf16> to vector<8x8xbf16>
    %46 = vector.extract_strided_slice %21 {offsets = [0, 8], sizes = [8, 8], strides = [1, 1]} : vector<8x128xbf16> to vector<8x8xbf16>
    %47 = vector.extract_strided_slice %22 {offsets = [0, 8], sizes = [8, 8], strides = [1, 1]} : vector<8x128xbf16> to vector<8x8xbf16>
    %cst_24 = arith.constant dense<0.000000e+00> : vector<8x8xf32>
    %48 = tpu.matmul %45, %46, %cst_24 {dimension_numbers = #tpu.dot_dimension_numbers<[1], [1], [0], [0], [0, 0, 1, 0], [], []>} : vector<8x8xbf16>, vector<8x8xbf16>, vector<8x8xf32> -> vector<8x8xf32>
    %cst_25 = arith.constant 0.353553385 : f32
    %49 = vector.broadcast %cst_25 : f32 to vector<8x8xf32>
    %50 = arith.mulf %48, %49 : vector<8x8xf32>
    %cst_26 = arith.constant 0.000000e+00 : f32
    %51 = vector.broadcast %cst_26 : f32 to vector<8x8xf32>
    %52 = arith.cmpf ogt, %5, %51 : vector<8x8xf32>
    %cst_27 = arith.constant -1.000000e+04 : f32
    %53 = vector.broadcast %cst_27 : f32 to vector<8x8xf32>
    %54 = arith.select %52, %50, %53 : vector<8x8xi1>, vector<8x8xf32>
    %cst_28 = arith.constant dense<0xFF800000> : vector<8xf32>
    %55 = vector.multi_reduction <maximumf>, %54, %cst_28 [1] : vector<8x8xf32> to vector<8xf32>
    %56 = vector.shape_cast %55 : vector<8xf32> to vector<8x1xf32>
    %57 = vector.broadcast %56 : vector<8x1xf32> to vector<8x8xf32>
    %58 = arith.subf %54, %57 : vector<8x8xf32>
    %59 = math.exp %58 : vector<8x8xf32>
    %cst_29 = arith.constant dense<0.000000e+00> : vector<8xf32>
    %60 = vector.multi_reduction <add>, %59, %cst_29 [1] : vector<8x8xf32> to vector<8xf32>
    %61 = vector.shape_cast %60 : vector<8xf32> to vector<8x1xf32>
    %62 = tpu.reciprocal %61 {approx = true} : vector<8x1xf32> -> vector<8x1xf32>
    %63 = vector.broadcast %62 : vector<8x1xf32> to vector<8x8xf32>
    %64 = arith.mulf %59, %63 : vector<8x8xf32>
    %65 = arith.truncf %64 : vector<8x8xf32> to vector<8x8xbf16>
    %cst_30 = arith.constant dense<0.000000e+00> : vector<8x8xf32>
    %66 = tpu.matmul %65, %47, %cst_30 {dimension_numbers = #tpu.dot_dimension_numbers<[1], [0], [0], [1], [0, 0, 1, 1], [], []>} : vector<8x8xbf16>, vector<8x8xbf16>, vector<8x8xf32> -> vector<8x8xf32>
    %67 = vector.extract_strided_slice %20 {offsets = [0, 16], sizes = [8, 8], strides = [1, 1]} : vector<8x128xbf16> to vector<8x8xbf16>
    %68 = vector.extract_strided_slice %21 {offsets = [0, 16], sizes = [8, 8], strides = [1, 1]} : vector<8x128xbf16> to vector<8x8xbf16>
    %69 = vector.extract_strided_slice %22 {offsets = [0, 16], sizes = [8, 8], strides = [1, 1]} : vector<8x128xbf16> to vector<8x8xbf16>
    %cst_31 = arith.constant dense<0.000000e+00> : vector<8x8xf32>
    %70 = tpu.matmul %67, %68, %cst_31 {dimension_numbers = #tpu.dot_dimension_numbers<[1], [1], [0], [0], [0, 0, 1, 0], [], []>} : vector<8x8xbf16>, vector<8x8xbf16>, vector<8x8xf32> -> vector<8x8xf32>
    %cst_32 = arith.constant 0.353553385 : f32
    %71 = vector.broadcast %cst_32 : f32 to vector<8x8xf32>
    %72 = arith.mulf %70, %71 : vector<8x8xf32>
    %cst_33 = arith.constant 0.000000e+00 : f32
    %73 = vector.broadcast %cst_33 : f32 to vector<8x8xf32>
    %74 = arith.cmpf ogt, %5, %73 : vector<8x8xf32>
    %cst_34 = arith.constant -1.000000e+04 : f32
    %75 = vector.broadcast %cst_34 : f32 to vector<8x8xf32>
    %76 = arith.select %74, %72, %75 : vector<8x8xi1>, vector<8x8xf32>
    %cst_35 = arith.constant dense<0xFF800000> : vector<8xf32>
    %77 = vector.multi_reduction <maximumf>, %76, %cst_35 [1] : vector<8x8xf32> to vector<8xf32>
    %78 = vector.shape_cast %77 : vector<8xf32> to vector<8x1xf32>
    %79 = vector.broadcast %78 : vector<8x1xf32> to vector<8x8xf32>
    %80 = arith.subf %76, %79 : vector<8x8xf32>
    %81 = math.exp %80 : vector<8x8xf32>
    %cst_36 = arith.constant dense<0.000000e+00> : vector<8xf32>
    %82 = vector.multi_reduction <add>, %81, %cst_36 [1] : vector<8x8xf32> to vector<8xf32>
    %83 = vector.shape_cast %82 : vector<8xf32> to vector<8x1xf32>
    %84 = tpu.reciprocal %83 {approx = true} : vector<8x1xf32> -> vector<8x1xf32>
    %85 = vector.broadcast %84 : vector<8x1xf32> to vector<8x8xf32>
    %86 = arith.mulf %81, %85 : vector<8x8xf32>
    %87 = arith.truncf %86 : vector<8x8xf32> to vector<8x8xbf16>
    %cst_37 = arith.constant dense<0.000000e+00> : vector<8x8xf32>
    %88 = tpu.matmul %87, %69, %cst_37 {dimension_numbers = #tpu.dot_dimension_numbers<[1], [0], [0], [1], [0, 0, 1, 1], [], []>} : vector<8x8xbf16>, vector<8x8xbf16>, vector<8x8xf32> -> vector<8x8xf32>
    %89 = vector.extract_strided_slice %20 {offsets = [0, 24], sizes = [8, 8], strides = [1, 1]} : vector<8x128xbf16> to vector<8x8xbf16>
    %90 = vector.extract_strided_slice %21 {offsets = [0, 24], sizes = [8, 8], strides = [1, 1]} : vector<8x128xbf16> to vector<8x8xbf16>
    %91 = vector.extract_strided_slice %22 {offsets = [0, 24], sizes = [8, 8], strides = [1, 1]} : vector<8x128xbf16> to vector<8x8xbf16>
    %cst_38 = arith.constant dense<0.000000e+00> : vector<8x8xf32>
    %92 = tpu.matmul %89, %90, %cst_38 {dimension_numbers = #tpu.dot_dimension_numbers<[1], [1], [0], [0], [0, 0, 1, 0], [], []>} : vector<8x8xbf16>, vector<8x8xbf16>, vector<8x8xf32> -> vector<8x8xf32>
    %cst_39 = arith.constant 0.353553385 : f32
    %93 = vector.broadcast %cst_39 : f32 to vector<8x8xf32>
    %94 = arith.mulf %92, %93 : vector<8x8xf32>
    %cst_40 = arith.constant 0.000000e+00 : f32
    %95 = vector.broadcast %cst_40 : f32 to vector<8x8xf32>
    %96 = arith.cmpf ogt, %5, %95 : vector<8x8xf32>
    %cst_41 = arith.constant -1.000000e+04 : f32
    %97 = vector.broadcast %cst_41 : f32 to vector<8x8xf32>
    %98 = arith.select %96, %94, %97 : vector<8x8xi1>, vector<8x8xf32>
    %cst_42 = arith.constant dense<0xFF800000> : vector<8xf32>
    %99 = vector.multi_reduction <maximumf>, %98, %cst_42 [1] : vector<8x8xf32> to vector<8xf32>
    %100 = vector.shape_cast %99 : vector<8xf32> to vector<8x1xf32>
    %101 = vector.broadcast %100 : vector<8x1xf32> to vector<8x8xf32>
    %102 = arith.subf %98, %101 : vector<8x8xf32>
    %103 = math.exp %102 : vector<8x8xf32>
    %cst_43 = arith.constant dense<0.000000e+00> : vector<8xf32>
    %104 = vector.multi_reduction <add>, %103, %cst_43 [1] : vector<8x8xf32> to vector<8xf32>
    %105 = vector.shape_cast %104 : vector<8xf32> to vector<8x1xf32>
    %106 = tpu.reciprocal %105 {approx = true} : vector<8x1xf32> -> vector<8x1xf32>
    %107 = vector.broadcast %106 : vector<8x1xf32> to vector<8x8xf32>
    %108 = arith.mulf %103, %107 : vector<8x8xf32>
    %109 = arith.truncf %108 : vector<8x8xf32> to vector<8x8xbf16>
    %cst_44 = arith.constant dense<0.000000e+00> : vector<8x8xf32>
    %110 = tpu.matmul %109, %91, %cst_44 {dimension_numbers = #tpu.dot_dimension_numbers<[1], [0], [0], [1], [0, 0, 1, 1], [], []>} : vector<8x8xbf16>, vector<8x8xbf16>, vector<8x8xf32> -> vector<8x8xf32>
    %111 = tpu.concatenate %44, %66, %88, %110 in 1 : vector<8x8xf32>, vector<8x8xf32>, vector<8x8xf32>, vector<8x8xf32> -> vector<8x32xf32>
    %112 = arith.truncf %111 : vector<8x32xf32> to vector<8x32xbf16>
    %c0_45 = arith.constant 0 : index
    %c0_46 = arith.constant 0 : index
    %113 = vector.load %arg8[%c0_45, %c0_46] : memref<128x128xbf16, #tpu.memory_space<vmem>>, vector<32x128xbf16>
    %cst_47 = arith.constant dense<0.000000e+00> : vector<8x128xf32>
    %114 = tpu.matmul %112, %113, %cst_47 {dimension_numbers = #tpu.dot_dimension_numbers<[1], [0], [0], [1], [0, 0, 1, 1], [], []>} : vector<8x32xbf16>, vector<32x128xbf16>, vector<8x128xf32> -> vector<8x128xf32>
    %c0_48 = arith.constant 0 : index
    %c0_49 = arith.constant 0 : index
    %115 = vector.load %arg9[%c0_48, %c0_49] : memref<1x128xf32, #tpu.memory_space<vmem>>, vector<1x128xf32>
    %116 = vector.broadcast %115 : vector<1x128xf32> to vector<8x128xf32>
    %117 = arith.addf %114, %116 : vector<8x128xf32>
    %118 = arith.addf %117, %1 : vector<8x128xf32>
    %c0_50 = arith.constant 0 : index
    %c0_51 = arith.constant 0 : index
    %119 = vector.load %arg10[%c0_50, %c0_51] : memref<1x128xf32, #tpu.memory_space<vmem>>, vector<1x128xf32>
    %c0_52 = arith.constant 0 : index
    %c0_53 = arith.constant 0 : index
    %120 = vector.load %arg11[%c0_52, %c0_53] : memref<1x128xf32, #tpu.memory_space<vmem>>, vector<1x128xf32>
    %121 = tpu.iota {dimensions = array<i32: 1>} : vector<1x128xi32>
    %c32_i32 = arith.constant 32 : i32
    %122 = vector.broadcast %c32_i32 : i32 to vector<1x128xi32>
    %123 = arith.cmpi slt, %121, %122 : vector<1x128xi32>
    %124 = arith.extui %123 : vector<1x128xi1> to vector<1x128xi32>
    %125 = arith.sitofp %124 : vector<1x128xi32> to vector<1x128xf32>
    %126 = vector.broadcast %125 : vector<1x128xf32> to vector<8x128xf32>
    %127 = arith.mulf %118, %126 : vector<8x128xf32>
    %cst_54 = arith.constant dense<0.000000e+00> : vector<8xf32>
    %128 = vector.multi_reduction <add>, %127, %cst_54 [1] : vector<8x128xf32> to vector<8xf32>
    %129 = vector.shape_cast %128 : vector<8xf32> to vector<8x1xf32>
    %cst_55 = arith.constant 3.125000e-02 : f32
    %130 = vector.broadcast %cst_55 : f32 to vector<8x1xf32>
    %131 = arith.mulf %129, %130 : vector<8x1xf32>
    %132 = vector.broadcast %131 : vector<8x1xf32> to vector<8x128xf32>
    %133 = arith.subf %118, %132 : vector<8x128xf32>
    %134 = vector.broadcast %125 : vector<1x128xf32> to vector<8x128xf32>
    %135 = arith.mulf %133, %134 : vector<8x128xf32>
    %136 = arith.mulf %135, %135 : vector<8x128xf32>
    %cst_56 = arith.constant dense<0.000000e+00> : vector<8xf32>
    %137 = vector.multi_reduction <add>, %136, %cst_56 [1] : vector<8x128xf32> to vector<8xf32>
    %138 = vector.shape_cast %137 : vector<8xf32> to vector<8x1xf32>
    %cst_57 = arith.constant 3.125000e-02 : f32
    %139 = vector.broadcast %cst_57 : f32 to vector<8x1xf32>
    %140 = arith.mulf %138, %139 : vector<8x1xf32>
    %141 = vector.broadcast %131 : vector<8x1xf32> to vector<8x128xf32>
    %142 = arith.subf %118, %141 : vector<8x128xf32>
    %cst_58 = arith.constant 9.99999996E-13 : f32
    %143 = vector.broadcast %cst_58 : f32 to vector<8x1xf32>
    %144 = arith.addf %140, %143 : vector<8x1xf32>
    %145 = math.rsqrt %144 : vector<8x1xf32>
    %146 = vector.broadcast %145 : vector<8x1xf32> to vector<8x128xf32>
    %147 = arith.mulf %142, %146 : vector<8x128xf32>
    %148 = vector.broadcast %119 : vector<1x128xf32> to vector<8x128xf32>
    %149 = arith.mulf %148, %147 : vector<8x128xf32>
    %150 = vector.broadcast %120 : vector<1x128xf32> to vector<8x128xf32>
    %151 = arith.addf %149, %150 : vector<8x128xf32>
    %c0_59 = arith.constant 0 : index
    %c0_60 = arith.constant 0 : index
    %c0_61 = arith.constant 0 : index
    %152 = vector.load %arg12[%c0_59, %c0_60, %c0_61] : memref<1x8x128xf32, #tpu.memory_space<vmem>>, vector<1x8x128xf32>
    %153 = vector.shape_cast %152 : vector<1x8x128xf32> to vector<8x128xf32>
    %154 = vector.shape_cast %151 : vector<8x128xf32> to vector<1x8x128xf32>
    tpu.vector_store %arg12[%c0_59, %c0_60, %c0_61], %154 {strides = array<i32>} : memref<1x8x128xf32, #tpu.memory_space<vmem>>, vector<1x8x128xf32>,
    return
  }
  func.func @transform_0(%arg0: i32) -> (i32, i32, i32) {
    %c0_i32 = arith.constant 0 : i32
    %c0_i32_0 = arith.constant 0 : i32
    %c0_i32_1 = arith.constant 0 : i32
    return %arg0, %c0_i32, %c0_i32_0 : i32, i32, i32
  }
  func.func @transform_1(%arg0: i32) -> (i32, i32, i32) {
    %c0_i32 = arith.constant 0 : i32
    %c0_i32_0 = arith.constant 0 : i32
    %c0_i32_1 = arith.constant 0 : i32
    return %arg0, %c0_i32, %c0_i32_0 : i32, i32, i32
  }
  func.func @transform_2(%arg0: i32) -> (i32, i32, i32) {
    %c0_i32 = arith.constant 0 : i32
    %c0_i32_0 = arith.constant 0 : i32
    %c0_i32_1 = arith.constant 0 : i32
    return %arg0, %c0_i32, %c0_i32_0 : i32, i32, i32
  }
  func.func @transform_3(%arg0: i32) -> (i32, i32) {
    %c0_i32 = arith.constant 0 : i32
    %c0_i32_0 = arith.constant 0 : i32
    %c0_i32_1 = arith.constant 0 : i32
    return %c0_i32, %c0_i32_0 : i32, i32
  }
  func.func @transform_4(%arg0: i32) -> (i32, i32) {
    %c0_i32 = arith.constant 0 : i32
    %c0_i32_0 = arith.constant 0 : i32
    %c0_i32_1 = arith.constant 0 : i32
    return %c0_i32, %c0_i32_0 : i32, i32
  }
  func.func @transform_5(%arg0: i32) -> (i32, i32) {
    %c0_i32 = arith.constant 0 : i32
    %c0_i32_0 = arith.constant 0 : i32
    %c0_i32_1 = arith.constant 0 : i32
    return %c0_i32, %c0_i32_0 : i32, i32
  }
  func.func @transform_6(%arg0: i32) -> (i32, i32) {
    %c0_i32 = arith.constant 0 : i32
    %c0_i32_0 = arith.constant 0 : i32
    %c0_i32_1 = arith.constant 0 : i32
    return %c0_i32, %c0_i32_0 : i32, i32
  }
  func.func @transform_7(%arg0: i32) -> (i32, i32) {
    %c0_i32 = arith.constant 0 : i32
    %c0_i32_0 = arith.constant 0 : i32
    %c0_i32_1 = arith.constant 0 : i32
    return %c0_i32, %c0_i32_0 : i32, i32
  }
  func.func @transform_8(%arg0: i32) -> (i32, i32) {
    %c0_i32 = arith.constant 0 : i32
    %c0_i32_0 = arith.constant 0 : i32
    %c0_i32_1 = arith.constant 0 : i32
    return %c0_i32, %c0_i32_0 : i32, i32
  }
  func.func @transform_9(%arg0: i32) -> (i32, i32) {
    %c0_i32 = arith.constant 0 : i32
    %c0_i32_0 = arith.constant 0 : i32
    %c0_i32_1 = arith.constant 0 : i32
    return %c0_i32, %c0_i32_0 : i32, i32
  }
  func.func @transform_10(%arg0: i32) -> (i32, i32) {
    %c0_i32 = arith.constant 0 : i32
    %c0_i32_0 = arith.constant 0 : i32
    %c0_i32_1 = arith.constant 0 : i32
    return %c0_i32, %c0_i32_0 : i32, i32
  }
  func.func @transform_11(%arg0: i32) -> (i32, i32, i32) {
    %c0_i32 = arith.constant 0 : i32
    %c0_i32_0 = arith.constant 0 : i32
    %c0_i32_1 = arith.constant 0 : i32
    return %arg0, %c0_i32, %c0_i32_0 : i32, i32, i32
  }
}

module attributes {stable_mosaic.version = 11 : i64} {
  func.func @ffn_ln_kernel(%arg0: i32, %arg1: memref<16x128xf32, #tpu.memory_space<vmem>>, %arg2: memref<128x128xbf16, #tpu.memory_space<vmem>>, %arg3: memref<1x128xf32, #tpu.memory_space<vmem>>, %arg4: memref<128x128xbf16, #tpu.memory_space<vmem>>, %arg5: memref<1x128xf32, #tpu.memory_space<vmem>>, %arg6: memref<1x128xf32, #tpu.memory_space<vmem>>, %arg7: memref<1x128xf32, #tpu.memory_space<vmem>>, %arg8: memref<16x128xf32, #tpu.memory_space<vmem>>) attributes {dimension_semantics = [#tpu.dimension_semantics<parallel>], iteration_bounds = array<i64: 1>, scalar_prefetch = 0 : i64, scratch_operands = 0 : i64, tpu.core_type = #tpu.core_type<tc>, window_params = [{transform_indices = @transform_0, window_bounds = array<i64: 16, 128>}, {pipeline_mode = #tpu.pipeline_mode<synchronous>, transform_indices = @transform_1, window_bounds = array<i64: 128, 128>}, {pipeline_mode = #tpu.pipeline_mode<synchronous>, transform_indices = @transform_2, window_bounds = array<i64: 1, 128>}, {pipeline_mode = #tpu.pipeline_mode<synchronous>, transform_indices = @transform_3, window_bounds = array<i64: 128, 128>}, {pipeline_mode = #tpu.pipeline_mode<synchronous>, transform_indices = @transform_4, window_bounds = array<i64: 1, 128>}, {pipeline_mode = #tpu.pipeline_mode<synchronous>, transform_indices = @transform_5, window_bounds = array<i64: 1, 128>}, {pipeline_mode = #tpu.pipeline_mode<synchronous>, transform_indices = @transform_6, window_bounds = array<i64: 1, 128>}, {transform_indices = @transform_7, window_bounds = array<i64: 16, 128>}]} {
    %c0 = arith.constant 0 : index
    %c0_0 = arith.constant 0 : index
    %0 = vector.load %arg1[%c0, %c0_0] : memref<16x128xf32, #tpu.memory_space<vmem>>, vector<16x128xf32>
    %1 = arith.truncf %0 : vector<16x128xf32> to vector<16x128xbf16>
    %c0_1 = arith.constant 0 : index
    %c0_2 = arith.constant 0 : index
    %2 = vector.load %arg2[%c0_1, %c0_2] : memref<128x128xbf16, #tpu.memory_space<vmem>>, vector<128x128xbf16>
    %cst = arith.constant dense<0.000000e+00> : vector<16x128xf32>
    %3 = tpu.matmul %1, %2, %cst {dimension_numbers = #tpu.dot_dimension_numbers<[1], [0], [0], [1], [0, 0, 1, 1], [], []>} : vector<16x128xbf16>, vector<128x128xbf16>, vector<16x128xf32> -> vector<16x128xf32>
    %c0_3 = arith.constant 0 : index
    %c0_4 = arith.constant 0 : index
    %4 = vector.load %arg3[%c0_3, %c0_4] : memref<1x128xf32, #tpu.memory_space<vmem>>, vector<1x128xf32>
    %5 = vector.broadcast %4 : vector<1x128xf32> to vector<16x128xf32>
    %6 = arith.addf %3, %5 : vector<16x128xf32>
    %cst_5 = arith.constant 0.000000e+00 : f32
    %7 = vector.broadcast %cst_5 : f32 to vector<16x128xf32>
    %8 = arith.maximumf %6, %7 : vector<16x128xf32>
    %9 = arith.truncf %8 : vector<16x128xf32> to vector<16x128xbf16>
    %c0_6 = arith.constant 0 : index
    %c0_7 = arith.constant 0 : index
    %10 = vector.load %arg4[%c0_6, %c0_7] : memref<128x128xbf16, #tpu.memory_space<vmem>>, vector<128x128xbf16>
    %cst_8 = arith.constant dense<0.000000e+00> : vector<16x128xf32>
    %11 = tpu.matmul %9, %10, %cst_8 {dimension_numbers = #tpu.dot_dimension_numbers<[1], [0], [0], [1], [0, 0, 1, 1], [], []>} : vector<16x128xbf16>, vector<128x128xbf16>, vector<16x128xf32> -> vector<16x128xf32>
    %c0_9 = arith.constant 0 : index
    %c0_10 = arith.constant 0 : index
    %12 = vector.load %arg5[%c0_9, %c0_10] : memref<1x128xf32, #tpu.memory_space<vmem>>, vector<1x128xf32>
    %13 = vector.broadcast %12 : vector<1x128xf32> to vector<16x128xf32>
    %14 = arith.addf %11, %13 : vector<16x128xf32>
    %15 = arith.addf %14, %0 : vector<16x128xf32>
    %c0_11 = arith.constant 0 : index
    %c0_12 = arith.constant 0 : index
    %16 = vector.load %arg6[%c0_11, %c0_12] : memref<1x128xf32, #tpu.memory_space<vmem>>, vector<1x128xf32>
    %c0_13 = arith.constant 0 : index
    %c0_14 = arith.constant 0 : index
    %17 = vector.load %arg7[%c0_13, %c0_14] : memref<1x128xf32, #tpu.memory_space<vmem>>, vector<1x128xf32>
    %18 = tpu.iota {dimensions = array<i32: 1>} : vector<1x128xi32>
    %c32_i32 = arith.constant 32 : i32
    %19 = vector.broadcast %c32_i32 : i32 to vector<1x128xi32>
    %20 = arith.cmpi slt, %18, %19 : vector<1x128xi32>
    %21 = arith.extui %20 : vector<1x128xi1> to vector<1x128xi32>
    %22 = arith.sitofp %21 : vector<1x128xi32> to vector<1x128xf32>
    %23 = vector.broadcast %22 : vector<1x128xf32> to vector<16x128xf32>
    %24 = arith.mulf %15, %23 : vector<16x128xf32>
    %cst_15 = arith.constant dense<0.000000e+00> : vector<16xf32>
    %25 = vector.multi_reduction <add>, %24, %cst_15 [1] : vector<16x128xf32> to vector<16xf32>
    %26 = vector.shape_cast %25 : vector<16xf32> to vector<16x1xf32>
    %cst_16 = arith.constant 3.125000e-02 : f32
    %27 = vector.broadcast %cst_16 : f32 to vector<16x1xf32>
    %28 = arith.mulf %26, %27 : vector<16x1xf32>
    %29 = vector.broadcast %28 : vector<16x1xf32> to vector<16x128xf32>
    %30 = arith.subf %15, %29 : vector<16x128xf32>
    %31 = vector.broadcast %22 : vector<1x128xf32> to vector<16x128xf32>
    %32 = arith.mulf %30, %31 : vector<16x128xf32>
    %33 = arith.mulf %32, %32 : vector<16x128xf32>
    %cst_17 = arith.constant dense<0.000000e+00> : vector<16xf32>
    %34 = vector.multi_reduction <add>, %33, %cst_17 [1] : vector<16x128xf32> to vector<16xf32>
    %35 = vector.shape_cast %34 : vector<16xf32> to vector<16x1xf32>
    %cst_18 = arith.constant 3.125000e-02 : f32
    %36 = vector.broadcast %cst_18 : f32 to vector<16x1xf32>
    %37 = arith.mulf %35, %36 : vector<16x1xf32>
    %38 = vector.broadcast %28 : vector<16x1xf32> to vector<16x128xf32>
    %39 = arith.subf %15, %38 : vector<16x128xf32>
    %cst_19 = arith.constant 9.99999996E-13 : f32
    %40 = vector.broadcast %cst_19 : f32 to vector<16x1xf32>
    %41 = arith.addf %37, %40 : vector<16x1xf32>
    %42 = math.rsqrt %41 : vector<16x1xf32>
    %43 = vector.broadcast %42 : vector<16x1xf32> to vector<16x128xf32>
    %44 = arith.mulf %39, %43 : vector<16x128xf32>
    %45 = vector.broadcast %16 : vector<1x128xf32> to vector<16x128xf32>
    %46 = arith.mulf %45, %44 : vector<16x128xf32>
    %47 = vector.broadcast %17 : vector<1x128xf32> to vector<16x128xf32>
    %48 = arith.addf %46, %47 : vector<16x128xf32>
    %c0_20 = arith.constant 0 : index
    %c0_21 = arith.constant 0 : index
    %49 = vector.load %arg8[%c0_20, %c0_21] : memref<16x128xf32, #tpu.memory_space<vmem>>, vector<16x128xf32>
    tpu.vector_store %arg8[%c0_20, %c0_21], %48 {strides = array<i32>} : memref<16x128xf32, #tpu.memory_space<vmem>>, vector<16x128xf32>,
    return
  }
  func.func @transform_0(%arg0: i32) -> (i32, i32) {
    %c0_i32 = arith.constant 0 : i32
    %c0_i32_0 = arith.constant 0 : i32
    return %arg0, %c0_i32 : i32, i32
  }
  func.func @transform_1(%arg0: i32) -> (i32, i32) {
    %c0_i32 = arith.constant 0 : i32
    %c0_i32_0 = arith.constant 0 : i32
    %c0_i32_1 = arith.constant 0 : i32
    return %c0_i32, %c0_i32_0 : i32, i32
  }
  func.func @transform_2(%arg0: i32) -> (i32, i32) {
    %c0_i32 = arith.constant 0 : i32
    %c0_i32_0 = arith.constant 0 : i32
    %c0_i32_1 = arith.constant 0 : i32
    return %c0_i32, %c0_i32_0 : i32, i32
  }
  func.func @transform_3(%arg0: i32) -> (i32, i32) {
    %c0_i32 = arith.constant 0 : i32
    %c0_i32_0 = arith.constant 0 : i32
    %c0_i32_1 = arith.constant 0 : i32
    return %c0_i32, %c0_i32_0 : i32, i32
  }
  func.func @transform_4(%arg0: i32) -> (i32, i32) {
    %c0_i32 = arith.constant 0 : i32
    %c0_i32_0 = arith.constant 0 : i32
    %c0_i32_1 = arith.constant 0 : i32
    return %c0_i32, %c0_i32_0 : i32, i32
  }
  func.func @transform_5(%arg0: i32) -> (i32, i32) {
    %c0_i32 = arith.constant 0 : i32
    %c0_i32_0 = arith.constant 0 : i32
    %c0_i32_1 = arith.constant 0 : i32
    return %c0_i32, %c0_i32_0 : i32, i32
  }
  func.func @transform_6(%arg0: i32) -> (i32, i32) {
    %c0_i32 = arith.constant 0 : i32
    %c0_i32_0 = arith.constant 0 : i32
    %c0_i32_1 = arith.constant 0 : i32
    return %c0_i32, %c0_i32_0 : i32, i32
  }
  func.func @transform_7(%arg0: i32) -> (i32, i32) {
    %c0_i32 = arith.constant 0 : i32
    %c0_i32_0 = arith.constant 0 : i32
    return %arg0, %c0_i32 : i32, i32
  }
}

</mosaic_0001>

<bundles_post_ra>
// kernel: _lambda_.21
= control target key start
LH: loop header
LB: loop body
LE: loop exit
PB: predicated region body
PF: predicated region fallthrough
CT: control target
= control target key end

     0   :  { %v224_v1 = vmov 0.0   ;;  %vm225_vm0 = vmmov 0   ;;  %s294_s0 = inlined_call_operand.vmem [shape: f32[16,128], index: 0, kind: input, shape index: {}]   ;;  %s295_s1 = inlined_call_operand.vmem [shape: bf16[128,128], index: 1, kind: input, shape index: {}]   ;;  %s296_s2 = inlined_call_operand.vmem [shape: f32[1,128], index: 2, kind: input, shape index: {}]   ;;  %s297_s3 = inlined_call_operand.hbm [shape: f32[16,128], index: 3, kind: output, shape index: {}]  }
   0x1   :  { %v192_v0 = vld [vmem:[%s295_s1] sm:$0xff]   ;;  %167 = vmatprep.subr.bf16.mxu0 %v224_v1  ;;  %v193_v2 = vld [vmem:[%s295_s1 + $0x8] sm:$0xff]   ;;  %183 = vmatprep.mubr.msk.bf16.mxu0 %vm225_vm0, %v224_v1  ;;  %v194_v3 = vld [vmem:[%s295_s1 + $0x10] sm:$0xff]  }
   0x2   :  { %168 = vmatpush3.bf16.msra.mxu0 %v192_v0 }
   0x3   :  { %169 = vmatprep.subr.bf16.mxu0 %v224_v1 }
   0x6   :  { %170 = vmatpush3.bf16.msra.mxu0 %v193_v2 }
   0x7   :  { %171 = vmatprep.subr.bf16.mxu0 %v224_v1 }
   0x8   :  { %8 = vsyncpa [#allocation3], 0  ;;  %v195_v4 = vld [vmem:[%s295_s1 + $0x18] sm:$0xff]   ;;  %v196_v5 = vld [vmem:[%s295_s1 + $0x20] sm:$0xff]   ;;  %s226_s7 = smov [#allocation2]  }
   0x9   :  { %v197_v6 = vld [vmem:[%s295_s1 + $0x28] sm:$0xff]   ;;  %v198_v7 = vld [vmem:[%s295_s1 + $0x30] sm:$0xff]   ;;  %v199_v8 = vld [vmem:[%s295_s1 + $0x38] sm:$0xff]   ;;  %s138_s8 = sshll.u32 %s226_s7, 4  ;;  %s139_s8 = int_to_ptr.vmem [resolvable:$true] %s138_s8 }
   0xa   :  { %172 = vmatpush3.bf16.msra.mxu0 %v194_v3  ;;  %v16_v9 = vld [vmem:[%s294_s0] sm:$0xff]  ;;  %v17_v10 = vld [vmem:[%s294_s0 + $0x8] sm:$0xff]  ;;  %s200_s0 = scalar_lea.vmem %s139_s8, 256  ;;  %p205_p1 = scmp.lt.s32.totalorder %s139_s8, %s139_s8 }
   0xb   :  { %173 = vmatprep.subr.bf16.mxu0 %v224_v1  ;;  %v18_v11 = vpack.c.bf16 %v17_v10, %v16_v9  ;;  %v149_v12 = vld [vmem:[%s296_s2] ss:$0 sm:$0xff]  ;;  %p201_p0 = scmp.ne.s32.totalorder %s139_s8, %s200_s0  ;;  %p206_p2 = scmp.lt.s32.totalorder %s200_s0, %s200_s0 }
   0xd   :  { %p207_p3 = por %p206_p2, %p205_p1 }
   0xe   :  { %174 = vmatpush3.bf16.msra.mxu0 %v195_v4 }
   0xf   :  { %175 = vmatprep.subr.bf16.mxu0 %v224_v1  ;;  %p208_p4 = pnand %p207_p3, %p201_p0 }
  0x12   :  { %176 = vmatpush3.bf16.msra.mxu0 %v196_v5 }
  0x13   :  { %177 = vmatprep.subr.bf16.mxu0 %v224_v1 }
  0x16   :  { %178 = vmatpush3.bf16.msra.mxu0 %v197_v6 }
  0x17   :  { %179 = vmatprep.subr.bf16.mxu0 %v224_v1 }
  0x1a   :  { %180 = vmatpush3.bf16.msra.mxu0 %v198_v7 }
  0x1b   :  { %181 = vmatprep.subr.bf16.mxu0 %v224_v1 }
  0x1e   :  { %182 = vmatpush3.bf16.msra.mxu0 %v199_v8 }
  0x21   :  { %184 = vmatmul.mubr.bf16.vlgmr.msra.gmra.mrb[0].mxu0 %v18_v11 }
  0xf4   :  { %v124_v13 = vpop.f32.mrb[0].mxu0 }
  0xf5   :  { %v125_v14 = vadd.f32 %v149_v12, %v124_v13  ;;  %v185_v15 = vpop.f32.mrb[1].mxu0 }
  0xf6   :  { %v127_v16 = vpop.f32.mrb[2].mxu0 }
  0xf7   :  { %131 = vst [vmem:[#allocation2] sm:$0xff] %v125_v14  ;;  %v128_v17 = vadd.f32 %v149_v12, %v127_v16  ;;  %v186_v18 = vpop.f32.mrb[3].mxu0 }
  0xf9   :  { %132 = vst [vmem:[#allocation2 + $0x8] sm:$0xff] %v128_v17 }
  0xfa   :  { %211 = shalt.err (!%p208_p4)
}
  0xfb   :  { %s212_s9 = scalar_lea.hbm %s297_s3, 256 }
  0xfc   :  { %p213_p5 = scmp.ne.s32.totalorder %s297_s3, %s212_s9  ;;  %p216_p6 = scmp.lt.u32.totalorder %s212_s9, %s297_s3 }
  0xfe   :  { %p218_p7 = pnand %p216_p6, %p213_p5 }
 0x100   :  { %221 = shalt.err (!%p218_p7)
}
 0x101   :  { %s227_s14 = smov 128   ;;  %s228_s15 = smov 8  }
 0x102   :  { %144 = dma.vmem_to_hbm [thread:$0]  %s139_s8, 256, %s297_s3, [#allocation3], %s227_s14, %s227_s14, %s228_s15  }
 0x103   :  { %222 = dma.done.wait [#allocation3], 256  }
 0x104   :  { %223 = vsyncadd [#allocation3], 4294967040 }
 0x105   :  { %148 = vsyncpa [#allocation3], 1 }

// kernel: _lambda_.12
= control target key start
LH: loop header
LB: loop body
LE: loop exit
PB: predicated region body
PF: predicated region fallthrough
CT: control target
= control target key end

     0   :  { %v415_v0 = vmov 0.0   ;;  %vm416_vm0 = vmmov 0   ;;  %v261_v30 = vlaneseq  ;;  %s548_s1 = inlined_call_operand.vmem [shape: bf16[128,128], index: 1, kind: input, shape index: {}]   ;;  %s549_s3 = inlined_call_operand.vmem [shape: bf16[128,128], index: 3, kind: input, shape index: {}]   ;;  %s550_s0 = inlined_call_operand.vmem [shape: f32[16,128], index: 0, kind: input, shape index: {}]   ;;  %s551_s2 = inlined_call_operand.vmem [shape: f32[1,128], index: 2, kind: input, shape index: {}]   ;;  %s552_s4 = inlined_call_operand.vmem [shape: f32[1,128], index: 4, kind: input, shape index: {}]   ;;  %s553_s5 = inlined_call_operand.vmem [shape: f32[1,128], index: 5, kind: input, shape index: {}]   ;;  %s554_s6 = inlined_call_operand.vmem [shape: f32[1,128], index: 6, kind: input, shape index: {}]   ;;  %s555_s7 = inlined_call_operand.vmem [shape: f32[16,128], index: 7, kind: output, shape index: {}]  }
   0x1   :  { %353 = vmatprep.subr.bf16.mxu0 %v415_v0  ;;  %v395_v1 = vld [vmem:[%s548_s1] sm:$0xff]   ;;  %369 = vmatprep.mubr.msk.bf16.mxu0 %vm416_vm0, %v415_v0  ;;  %v396_v2 = vld [vmem:[%s548_s1 + $0x8] sm:$0xff]   ;;  %v397_v3 = vld [vmem:[%s548_s1 + $0x10] sm:$0xff]  }
   0x2   :  { %373 = vmatprep.subr.bf16.mxu1 %v415_v0  ;;  %389 = vmatprep.mubr.msk.bf16.mxu1 %vm416_vm0, %v415_v0  ;;  %v403_v4 = vld [vmem:[%s549_s3] sm:$0xff]   ;;  %v398_v5 = vld [vmem:[%s548_s1 + $0x18] sm:$0xff]   ;;  %v404_v6 = vld [vmem:[%s549_s3 + $0x8] sm:$0xff]   ;;  %v262_v31 = vand.u32 127, %v261_v30 }
   0x3   :  { %354 = vmatpush3.bf16.msra.mxu0 %v395_v1  ;;  %374 = vmatpush3.bf16.msra.mxu1 %v403_v4  ;;  %v399_v7 = vld [vmem:[%s548_s1 + $0x20] sm:$0xff]   ;;  %v405_v8 = vld [vmem:[%s549_s3 + $0x10] sm:$0xff]   ;;  %v400_v9 = vld [vmem:[%s548_s1 + $0x28] sm:$0xff]  }
   0x4   :  { %355 = vmatprep.subr.bf16.mxu0 %v415_v0  ;;  %375 = vmatprep.subr.bf16.mxu1 %v415_v0  ;;  %v406_v10 = vld [vmem:[%s549_s3 + $0x18] sm:$0xff]   ;;  %v401_v11 = vld [vmem:[%s548_s1 + $0x30] sm:$0xff]   ;;  %v407_v12 = vld [vmem:[%s549_s3 + $0x20] sm:$0xff]   ;;  %vm263_vm1 = vcmp.lt.s32.totalorder %v262_v31, 32 }
   0x5   :  { %v402_v13 = vld [vmem:[%s548_s1 + $0x38] sm:$0xff]   ;;  %v27_v14 = vld [vmem:[%s550_s0] sm:$0xff]  ;;  %v28_v15 = vld [vmem:[%s550_s0 + $0x8] sm:$0xff]  ;;  %v332_v37 = vsel %vm263_vm1, 1.0, %v415_v0 }
   0x6   :  { %v408_v16 = vld [vmem:[%s549_s3 + $0x28] sm:$0xff]   ;;  %v29_v17 = vpack.c.bf16 %v28_v15, %v27_v14  ;;  %v409_v18 = vld [vmem:[%s549_s3 + $0x30] sm:$0xff]   ;;  %v410_v19 = vld [vmem:[%s549_s3 + $0x38] sm:$0xff]  }
   0x7   :  { %356 = vmatpush3.bf16.msra.mxu0 %v396_v2  ;;  %376 = vmatpush3.bf16.msra.mxu1 %v404_v6  ;;  %v314_v20 = vld [vmem:[%s551_s2] ss:$0 sm:$0xff] }
   0x8   :  { %357 = vmatprep.subr.bf16.mxu0 %v415_v0  ;;  %377 = vmatprep.subr.bf16.mxu1 %v415_v0  ;;  %v323_v32 = vld [vmem:[%s552_s4] ss:$0 sm:$0xff] }
   0x9   :  { %v333_v61 = vld [vmem:[%s553_s5] ss:$0 sm:$0xff] }
   0xa   :  { %v334_v63 = vld [vmem:[%s554_s6] ss:$0 sm:$0xff] }
   0xb   :  { %358 = vmatpush3.bf16.msra.mxu0 %v397_v3  ;;  %378 = vmatpush3.bf16.msra.mxu1 %v405_v8 }
   0xc   :  { %359 = vmatprep.subr.bf16.mxu0 %v415_v0  ;;  %379 = vmatprep.subr.bf16.mxu1 %v415_v0 }
   0xf   :  { %360 = vmatpush3.bf16.msra.mxu0 %v398_v5  ;;  %380 = vmatpush3.bf16.msra.mxu1 %v406_v10 }
  0x10   :  { %361 = vmatprep.subr.bf16.mxu0 %v415_v0  ;;  %381 = vmatprep.subr.bf16.mxu1 %v415_v0 }
  0x13   :  { %362 = vmatpush3.bf16.msra.mxu0 %v399_v7  ;;  %382 = vmatpush3.bf16.msra.mxu1 %v407_v12 }
  0x14   :  { %363 = vmatprep.subr.bf16.mxu0 %v415_v0  ;;  %383 = vmatprep.subr.bf16.mxu1 %v415_v0 }
  0x17   :  { %364 = vmatpush3.bf16.msra.mxu0 %v400_v9  ;;  %384 = vmatpush3.bf16.msra.mxu1 %v408_v16 }
  0x18   :  { %365 = vmatprep.subr.bf16.mxu0 %v415_v0  ;;  %385 = vmatprep.subr.bf16.mxu1 %v415_v0 }
  0x1b   :  { %366 = vmatpush3.bf16.msra.mxu0 %v401_v11  ;;  %386 = vmatpush3.bf16.msra.mxu1 %v409_v18 }
  0x1c   :  { %367 = vmatprep.subr.bf16.mxu0 %v415_v0  ;;  %387 = vmatprep.subr.bf16.mxu1 %v415_v0 }
  0x1f   :  { %368 = vmatpush3.bf16.msra.mxu0 %v402_v13  ;;  %388 = vmatpush3.bf16.msra.mxu1 %v410_v19 }
  0x22   :  { %370 = vmatmul.mubr.bf16.vlgmr.msra.gmra.mrb[0].mxu0 %v29_v17 }
  0xf5   :  { %v135_v21 = vpop.f32.mrb[0].mxu0 }
  0xf6   :  { %v136_v22 = vadd.f32 %v314_v20, %v135_v21  ;;  %v371_v23 = vpop.f32.mrb[1].mxu0 }
  0xf7   :  { %v138_v24 = vpop.f32.mrb[2].mxu0 }
  0xf8   :  { %v139_v25 = vadd.f32 %v314_v20, %v138_v24  ;;  %v372_v26 = vpop.f32.mrb[3].mxu0  ;;  %v142_v27 = vmax.f32 %v136_v22, 0.0 }
  0xfa   :  { %v143_v28 = vmax.f32 %v139_v25, 0.0 }
  0xfc   :  { %v144_v29 = vpack.c.bf16 %v143_v28, %v142_v27 }
  0xfe   :  { %390 = vmatmul.mubr.bf16.vlgmr.msra.gmra.mrb[0].mxu1 %v144_v29 }
 0x1d1   :  { %v250_v33 = vpop.f32.mrb[0].mxu1 }
 0x1d2   :  { %v251_v34 = vadd.f32 %v323_v32, %v250_v33  ;;  %v391_v35 = vpop.f32.mrb[1].mxu1 }
 0x1d3   :  { %v253_v36 = vpop.f32.mrb[2].mxu1 }
 0x1d4   :  { %v254_v38 = vadd.f32 %v323_v32, %v253_v36  ;;  %v392_v39 = vpop.f32.mrb[3].mxu1  ;;  %v257_v40 = vadd.f32 %v251_v34, %v27_v14 }
 0x1d6   :  { %v258_v41 = vadd.f32 %v254_v38, %v28_v15  ;;  %v266_v42 = vmul.f32 %v332_v37, %v257_v40 }
 0x1d8   :  { %268 = vadd.xlane.f32.xlu0 %v266_v42  ;;  %v267_v43 = vmul.f32 %v332_v37, %v258_v41 }
 0x1dc   :  { %270 = vadd.xlane.f32.xlu0 %v267_v43 }
 0x265   :  { %v269_v44 = vpop.xlane.xlu0 %268 }
 0x266   :  { %v272_v45 = vmul.f32 0.03125, %v269_v44 }
 0x268   :  { %v274_v46 = vsub.f32 %v257_v40, %v272_v45 }
 0x269   :  { %v271_v47 = vpop.xlane.xlu0 %270 }
 0x26a   :  { %v273_v48 = vmul.f32 0.03125, %v271_v47  ;;  %v276_v49 = vmul.f32 %v332_v37, %v274_v46 }
 0x26c   :  { %v275_v50 = vsub.f32 %v258_v41, %v273_v48  ;;  %v278_v51 = vmul.f32 %v276_v49, %v276_v49 }
 0x26e   :  { %280 = vadd.xlane.f32.xlu1 %v278_v51  ;;  %v277_v52 = vmul.f32 %v332_v37, %v275_v50 }
 0x270   :  { %v279_v53 = vmul.f32 %v277_v52, %v277_v52 }
 0x272   :  { %282 = vadd.xlane.f32.xlu1 %v279_v53 }
 0x2fb   :  { %v281_v54 = vpop.xlane.xlu1 %280 }
 0x2fc   :  { %v284_v55 = vmul.f32 0.03125, %v281_v54 }
 0x2fe   :  { %v286_v56 = vadd.f32 1e-12, %v284_v55 }
 0x2ff   :  { %v283_v57 = vpop.xlane.xlu1 %282 }
 0x300   :  { %411 = vrsqrt.f32 %v286_v56  ;;  %v285_v58 = vmul.f32 0.03125, %v283_v57 }
 0x302   :  { %v287_v59 = vadd.f32 1e-12, %v285_v58 }
 0x304   :  { %413 = vrsqrt.f32 %v287_v59 }
 0x30a   :  { %v412_v60 = vpop.eup %411 }
 0x30b   :  { %v290_v62 = vmul.f32 %v412_v60, %v274_v46 }
 0x30d   :  { %v298_v0 = vmul.f32 %v333_v61, %v290_v62 }
 0x30e   :  { %v414_v1 = vpop.eup %413 }
 0x30f   :  { %v306_v2 = vadd.f32 %v334_v63, %v298_v0  ;;  %v291_v3 = vmul.f32 %v414_v1, %v275_v50 }
 0x311   :  { %308 = vst [vmem:[%s555_s7] sm:$0xff] %v306_v2  ;;  %v299_v4 = vmul.f32 %v333_v61, %v291_v3 }
 0x313   :  { %v307_v5 = vadd.f32 %v334_v63, %v299_v4 }
 0x315   :  { %309 = vst [vmem:[%s555_s7 + $0x8] sm:$0xff] %v307_v5 }

// kernel: _lambda_.15
= control target key start
LH: loop header
LB: loop body
LE: loop exit
PB: predicated region body
PF: predicated region fallthrough
CT: control target
= control target key end

     0   :  { %s1632_s17 = smov 0   ;;  %s1848_s0 = inlined_call_operand.vmem [shape: f32[2,8,128], index: 0, kind: input, shape index: {}, may-alias: {0,1}]   ;;  %s1849_s1 = inlined_call_operand.vmem [shape: f32[2,8,128], index: 1, kind: input, shape index: {}, may-alias: {0,1}]   ;;  %s1850_s2 = inlined_call_operand.vmem [shape: f32[2,8,8], index: 2, kind: input, shape index: {}]   ;;  %s1851_s3 = inlined_call_operand.vmem [shape: bf16[128,128], index: 3, kind: input, shape index: {}]   ;;  %s1852_s4 = inlined_call_operand.vmem [shape: f32[1,128], index: 4, kind: input, shape index: {}]   ;;  %s1853_s5 = inlined_call_operand.vmem [shape: bf16[128,256], index: 5, kind: input, shape index: {}]   ;;  %s1854_s6 = inlined_call_operand.vmem [shape: f32[1,256], index: 6, kind: input, shape index: {}]   ;;  %s1855_s7 = inlined_call_operand.vmem [shape: bf16[128,128], index: 7, kind: input, shape index: {}]   ;;  %s1856_s8 = inlined_call_operand.vmem [shape: f32[1,128], index: 8, kind: input, shape index: {}]   ;;  %s1857_s9 = inlined_call_operand.vmem [shape: f32[1,128], index: 9, kind: input, shape index: {}]   ;;  %s1858_s10 = inlined_call_operand.vmem [shape: f32[1,128], index: 10, kind: input, shape index: {}]   ;;  %s1859_s11 = inlined_call_operand.vmem [shape: f32[2,8,128], index: 11, kind: output, shape index: {}]  }
   0x1 LB: > { %s1331_s18 = sadd.s32 4294967295, %s1561_s17   ;;  %p1335_p0 = scmp.ge.s32.totalorder %s1561_s17, 1  ;;  %s1561_s17 = sphi %s1632_s17, %s21_s17  }
   0x2   : > { %p354_p1 = scmp.lt.s32.totalorder %s1561_s17, 3 }
   0x4   : > { %p355_p2 = pnand %p1335_p0, %p354_p1 }
   0x5   : > { %v1503_v0 = vld [vmem:[%s1853_s5 + $0x4] ss:$8 sps:$4 sm:$0xff] (!%p355_p2)   ;;  %v1505_v1 = vld [vmem:[%s1853_s5] ss:$8 sps:$4 sm:$0xff] (!%p355_p2)   ;;  %v1563_v2 = vmov (!%p355_p2), 0.0   ;;  %v1564_v3 = vmov (!%p355_p2), 0   ;;  %v551_v30 = vlaneseq (!%p355_p2) }
   0x6   : > { %358 = sbr.rel (%p355_p2) target bundleno = 1788 (0x6fc), region = 64  ;;  %1410 = vmatprep.subr.bf16.mxu0 (!%p355_p2), %v1563_v2  ;;  %673 = vmatprep.mubr.bf16.mxu1 (!%p355_p2), %v1564_v3  ;;  %v1506_v4 = vld [vmem:[%s1853_s5 + $0x14] ss:$8 sps:$4 sm:$0xff] (!%p355_p2)   ;;  %vm1565_vm0 = vmmov (!%p355_p2), 0   ;;  %v1508_v5 = vld [vmem:[%s1851_s3] sm:$0xff] (!%p355_p2)   ;;  %v1512_v8 = vld [vmem:[%s1851_s3 + $0x8] sm:$0xff] (!%p355_p2)  }
   0x7   : > { %641 = vmatprep.subr.bf16.mxu1 (!%p355_p2), %v1503_v0  ;;  %1426 = vmatprep.mubr.msk.bf16.mxu0 (!%p355_p2), %vm1565_vm0, %v1563_v2  ;;  %v1509_v6 = vld [vmem:[%s1853_s5 + $0x10] ss:$8 sps:$4 sm:$0xff] (!%p355_p2)   ;;  %v1510_v7 = vld [vmem:[%s1853_s5 + $0x24] ss:$8 sps:$4 sm:$0xff] (!%p355_p2)   ;;  %v1513_v9 = vld [vmem:[%s1853_s5 + $0x20] ss:$8 sps:$4 sm:$0xff] (!%p355_p2)  }
   0x8   : > { %642 = vmatpush1.bf16.msra.mxu1 (!%p355_p2), %v1505_v1  ;;  %1411 = vmatpush3.bf16.msra.mxu0 (!%p355_p2), %v1508_v5  ;;  %v1514_v10 = vld [vmem:[%s1853_s5 + $0x34] ss:$8 sps:$4 sm:$0xff] (!%p355_p2)   ;;  %v1517_v12 = vld [vmem:[%s1853_s5 + $0x30] ss:$8 sps:$4 sm:$0xff] (!%p355_p2)   ;;  %v1518_v13 = vld [vmem:[%s1853_s5 + $0x44] ss:$8 sps:$4 sm:$0xff] (!%p355_p2)  }
   0x9   : > { %643 = vmatprep.subr.bf16.mxu1 (!%p355_p2), %v1506_v4  ;;  %1412 = vmatprep.subr.bf16.mxu0 (!%p355_p2), %v1563_v2  ;;  %v1516_v11 = vld [vmem:[%s1851_s3 + $0x10] sm:$0xff] (!%p355_p2)   ;;  %v1520_v14 = vld [vmem:[%s1851_s3 + $0x18] sm:$0xff] (!%p355_p2)   ;;  %p400_p3 = scmp.lt.s32.totalorder (!%p355_p2), %s1331_s18, 1  ;;  %v1521_v15 = vld [vmem:[%s1853_s5 + $0x40] ss:$8 sps:$4 sm:$0xff] (!%p355_p2)   ;;  %v552_v31 = vshrl.u32 (!%p355_p2), %v551_v30, 7 }
   0xa   : > { %v1522_v16 = vld [vmem:[%s1853_s5 + $0x54] ss:$8 sps:$4 sm:$0xff] (!%p355_p2)   ;;  %v1524_v17 = vld [vmem:[%s1851_s3 + $0x20] sm:$0xff] (!%p355_p2)   ;;  %v1525_v18 = vld [vmem:[%s1853_s5 + $0x50] ss:$8 sps:$4 sm:$0xff] (!%p355_p2)   ;;  %vm685_vm1 = vcmask (!%p355_p2), 64512  }
   0xb   : > { %v1526_v19 = vld [vmem:[%s1853_s5 + $0x64] ss:$8 sps:$4 sm:$0xff] (!%p355_p2)   ;;  %v1529_v21 = vld [vmem:[%s1853_s5 + $0x60] ss:$8 sps:$4 sm:$0xff] (!%p355_p2)   ;;  %v1530_v22 = vld [vmem:[%s1853_s5 + $0x74] ss:$8 sps:$4 sm:$0xff] (!%p355_p2)  }
   0xc   : > { %644 = vmatpush1.bf16.msra.mxu1 (!%p355_p2), %v1509_v6  ;;  %1413 = vmatpush3.bf16.msra.mxu0 (!%p355_p2), %v1512_v8  ;;  %v1528_v20 = vld [vmem:[%s1851_s3 + $0x28] sm:$0xff] (!%p355_p2)   ;;  %v1532_v23 = vld [vmem:[%s1851_s3 + $0x30] sm:$0xff] (!%p355_p2)   ;;  %v1534_v26 = vld [vmem:[%s1851_s3 + $0x38] sm:$0xff] (!%p355_p2)   ;;  %v553_v32 = vsub.s32 (!%p355_p2), 0, %v552_v31  ;;  %v557_v34 = vsub.s32 (!%p355_p2), 1, %v552_v31  ;;  %vm750_vm2 = vcmask (!%p355_p2), 1043456  }
   0xd   : > { %645 = vmatprep.subr.bf16.mxu1 %v1510_v7  ;;  %1414 = vmatprep.subr.bf16.mxu0 %v1563_v2  ;;  %s1861_s18 = smov (!%p400_p3, %s1331_s18), 1  ;;  %v1533_v24 = vld [vmem:[%s1853_s5 + $0x70] ss:$8 sps:$4 sm:$0xff]   ;;  %v549_v33 = vld [vmem:[%s1854_s6] sm:$0x3]  ;;  %s1566_s27 = smov 112  }
   0xe   : > { %s1708_s23 = sshll.u32 %s1861_s18, 3  ;;  %v554_v35 = vrot.slane %v549_v33, %v553_v32  ;;  %v558_v36 = vrot.slane %v549_v33, %v557_v34  ;;  %v1340_v38 = vld [vmem:[%s1852_s4] ss:$0 sm:$0xff]  ;;  %s1567_s28 = smov 120   ;;  %vm1146_vm4 = vcmask 130048   ;;  %vm1148_vm5 = vcmask 195584  }
   0xf   : > { %s407_s30 = scalar_lea.vmem %s1849_s1, %s1708_s23  ;;  %s403_s15 = scalar_lea.vmem %s1848_s0, %s1708_s23  ;;  %vm1174_vm6 = vcmask 261120  }
  0x10   : > { %646 = vmatpush1.bf16.msra.mxu1 %v1513_v9  ;;  %1415 = vmatpush3.bf16.msra.mxu0 %v1516_v11  ;;  %v418_v25 = vld [vmem:[%s407_s30] sm:$0xff]  ;;  %s1568_s29 = smov 104   ;;  %s411_s12 = scalar_lea.vmem %s1850_s2, %s1708_s23 }
  0x11   : > { %647 = vmatprep.subr.bf16.mxu1 %v1514_v10  ;;  %1416 = vmatprep.subr.bf16.mxu0 %v1563_v2  ;;  %v1735_v27 = vld [vmem:[%s403_s15] sm:$0xff]  ;;  %v532_v28 = vpack.c.bf16 %v418_v25, %v418_v25  ;;  %s1569_s15 = smov 8   ;;  %s1570_s20 = smov 16  }
  0x12   : > { %v420_v29 = vpack.c.bf16 %v1735_v27, %v1735_v27  ;;  %v419_v63 = vld [vmem:[%s411_s12] sm:$0xff]  ;;  %s1571_s21 = smov 24   ;;  %s415_s18 = scalar_lea.vmem %s1859_s11, %s1708_s23 }
  0x13   : > { %vm733_vm3 = vcmp.gt.f32.partialorder %v419_v63, 0.0 }
  0x14   : > { %648 = vmatpush1.bf16.msra.mxu1 %v1517_v12  ;;  %1417 = vmatpush3.bf16.msra.mxu0 %v1520_v14 }
  0x15   : > { %649 = vmatprep.subr.bf16.mxu1 %v1518_v13  ;;  %1418 = vmatprep.subr.bf16.mxu0 %v1563_v2 }
  0x18   : > { %650 = vmatpush1.bf16.msra.mxu1 %v1521_v15  ;;  %1419 = vmatpush3.bf16.msra.mxu0 %v1524_v17 }
  0x19   : > { %651 = vmatprep.subr.bf16.mxu1 %v1522_v16  ;;  %1420 = vmatprep.subr.bf16.mxu0 %v1563_v2 }
  0x1c   : > { %652 = vmatpush1.bf16.msra.mxu1 %v1525_v18  ;;  %1421 = vmatpush3.bf16.msra.mxu0 %v1528_v20 }
  0x1d   : > { %653 = vmatprep.subr.bf16.mxu1 %v1526_v19  ;;  %1422 = vmatprep.subr.bf16.mxu0 %v1563_v2 }
  0x20   : > { %654 = vmatpush1.bf16.msra.mxu1 %v1529_v21  ;;  %1423 = vmatpush3.bf16.msra.mxu0 %v1532_v23 }
  0x21   : > { %655 = vmatprep.subr.bf16.mxu1 %v1530_v22  ;;  %1424 = vmatprep.subr.bf16.mxu0 %v1563_v2 }
  0x24   : > { %656 = vmatpush1.bf16.msra.mxu1 %v1533_v24  ;;  %1425 = vmatpush3.bf16.msra.mxu0 %v1534_v26 }
  0x25   : > { %1436 = vmatprep.subr.bf16.mxu1 %v1563_v2  ;;  %1430 = vmatprep.subr.bf16.mxu0 %v1563_v2 }
  0x27   : > { %674 = vmatmul.mubr.bf16.vlgmr.msra.gmra.mrb[0].mxu1 %v532_v28  ;;  %1427 = vmatmul.mubr.bf16.vlgmr.msra.gmra.mrb[0].mxu0 %v420_v29 }
  0x28   : > { %1438 = vmatprep.mubr.msk.bf16.mxu1 %vm1565_vm0, %v1563_v2  ;;  %1432 = vmatprep.mubr.msk.bf16.mxu0 %vm1565_vm0, %v1563_v2 }
  0xfa   : > { %v675_v37 = vpop.f32.mrb[0].mxu1  ;;  %v526_v43 = vpop.f32.mrb[0].mxu0 }
  0xfb   : > { %v676_v39 = vadd.f32 %v675_v37, %v554_v35  ;;  %v677_v40 = vpop.f32.mrb[1].mxu1  ;;  %v527_v46 = vadd.f32 %v1340_v38, %v526_v43  ;;  %v1428_v47 = vpop.f32.mrb[1].mxu0 }
  0xfc   : > { %v678_v41 = vadd.f32 %v677_v40, %v558_v36  ;;  %v679_v42 = vpop.f32.mrb[2].mxu1  ;;  %v529_v49 = vpop.f32.mrb[2].mxu0 }
  0xfd   : > { %v683_v44 = vpack.c.bf16 %v676_v39, %v676_v39  ;;  %v680_v45 = vpop.f32.mrb[3].mxu1  ;;  %v682_v50 = vpack.c.bf16 %v527_v46, %v527_v46  ;;  %v1429_v52 = vpop.f32.mrb[3].mxu0 }
  0xfe   : > { %v1753_v48 = vpack.c.bf16 %v678_v41, %v678_v41 }
  0xff   : > { %911 = vrot.lane.b32.xlu1 %v683_v44, %s1566_s27  ;;  %798 = vrot.lane.b32.xlu0 %v683_v44, %s1567_s28  ;;  %v690_v51 = vsel %vm685_vm1, %v683_v44, 0 }
 0x100   : > { %1431 = vmatpush3.bf16.xpose.msra.mxu0 %v690_v51  ;;  %v752_v53 = vsel %vm750_vm2, %v1753_v48, 0 }
 0x101   : > { %1437 = vmatpush3.bf16.msra.mxu1 %v752_v53  ;;  %1442 = vmatprep.subr.bf16.mxu0 %v1563_v2 }
 0x102   : > { %1448 = vmatprep.subr.bf16.mxu1 %v1563_v2 }
 0x103   : > { %909 = vrot.lane.b32.xlu1 %v682_v50, %s1566_s27  ;;  %795 = vrot.lane.b32.xlu0 %v682_v50, %s1567_s28 }
 0x107   : > { %1021 = vrot.lane.b32.xlu1 %v682_v50, %s1568_s29  ;;  %1023 = vrot.lane.b32.xlu0 %v683_v44, %s1568_s29 }
 0x108   : > { %1433 = vmatmul.mubr.msk.bf16.vlgmr.msra.gmra.mrb[4].mxu0 %vm685_vm1, %v682_v50 }
 0x109   : > { %1444 = vmatprep.mubr.msk.bf16.mxu0 %vm1565_vm0, %v1563_v2 }
 0x171   : > { %v799_v54 = vpop.permute.xlu0 %798  ;;  %v912_v56 = vpop.permute.xlu1 %911 }
 0x172   : > { %v804_v55 = vsel %vm685_vm1, %v799_v54, 0  ;;  %v917_v58 = vsel %vm685_vm1, %v912_v56, 0 }
 0x173   : > { %1443 = vmatpush3.bf16.xpose.msra.mxu0 %v804_v55 }
 0x174   : > { %1454 = vmatprep.subr.bf16.mxu0 %v1563_v2 }
 0x175   : > { %v796_v57 = vpop.permute.xlu0 %795  ;;  %v910_v60 = vpop.permute.xlu1 %909 }
 0x179   : > { %v1024_v59 = vpop.permute.xlu0 %1023  ;;  %v1022_v62 = vpop.permute.xlu1 %1021 }
 0x17a   : > { %1445 = vmatmul.mubr.msk.bf16.vlgmr.msra.gmra.mrb[8].mxu0 %vm685_vm1, %v796_v57  ;;  %v1029_v61 = vsel %vm685_vm1, %v1024_v59, 0 }
 0x17b   : > { %1455 = vmatpush3.bf16.xpose.msra.mxu0 %v917_v58  ;;  %1456 = vmatprep.mubr.msk.bf16.mxu0 %vm1565_vm0, %v1563_v2 }
 0x17c   : > { %1466 = vmatprep.subr.bf16.mxu0 %v1563_v2 }
 0x182   : > { %1457 = vmatmul.mubr.msk.bf16.vlgmr.msra.gmra.mrb[12].mxu0 %vm685_vm1, %v910_v60 }
 0x183   : > { %1467 = vmatpush3.bf16.xpose.msra.mxu0 %v1029_v61  ;;  %1468 = vmatprep.mubr.msk.bf16.mxu0 %vm1565_vm0, %v1563_v2 }
 0x184   : > { %1478 = vmatprep.subr.bf16.mxu0 %v1563_v2 }
 0x18a   : > { %1469 = vmatmul.mubr.msk.bf16.vlgmr.msra.gmra.mrb[16].mxu0 %vm685_vm1, %v1022_v62 }
 0x18b   : > { %1482 = vmatprep.mubr.msk.bf16.mxu0 %vm1565_vm0, %v1563_v2 }
 0x1db   : > { %v726_v0 = vpop.f32.mrb[4].mxu0 }
 0x1dc   : > { %v732_v1 = vmul.f32 0.35355338, %v726_v0  ;;  %v1434_v3 = vpop.f32.mrb[5].mxu0 }
 0x1dd   : > { %v729_v4 = vpop.f32.mrb[6].mxu0 }
 0x1de   : > { %v1435_v5 = vpop.f32.mrb[7].mxu0  ;;  %v734_v6 = vsel %vm733_vm3, %v732_v1, -10000.0 }
 0x1df   : > { %v735_v7 = vsel %vm685_vm1, %v734_v6, -inf }
 0x1e0   : > { %736 = vmax.xlane.f32.xlu0 %v735_v7 }
 0x24d   : > { %v840_v8 = vpop.f32.mrb[8].mxu0 }
 0x24e   : > { %v846_v9 = vmul.f32 0.35355338, %v840_v8  ;;  %v1446_v10 = vpop.f32.mrb[9].mxu0 }
 0x24f   : > { %v843_v11 = vpop.f32.mrb[10].mxu0 }
 0x250   : > { %v1447_v12 = vpop.f32.mrb[11].mxu0  ;;  %v847_v13 = vsel %vm733_vm3, %v846_v9, -10000.0 }
 0x251   : > { %v848_v14 = vsel %vm685_vm1, %v847_v13, -inf }
 0x252   : > { %849 = vmax.xlane.f32.xlu1 %v848_v14  ;;  %v1535_v14 = vld [vmem:[%s1855_s7] sm:$0xff]  }
 0x253   : > { %1479 = vmatpush3.bf16.msra.mxu0 %v1535_v14 }
 0x254   : > { %1480 = vmatprep.subr.bf16.mxu0 %v1563_v2 }
 0x255   : > { %v953_v15 = vpop.f32.mrb[12].mxu0 }
 0x256   : > { %v959_v16 = vmul.f32 0.35355338, %v953_v15  ;;  %v1458_v17 = vpop.f32.mrb[13].mxu0 }
 0x257   : > { %v956_v18 = vpop.f32.mrb[14].mxu0 }
 0x258   : > { %v1459_v19 = vpop.f32.mrb[15].mxu0  ;;  %v960_v20 = vsel %vm733_vm3, %v959_v16, -10000.0 }
 0x259   : > { %v961_v21 = vsel %vm685_vm1, %v960_v20, -inf  ;;  %v1536_v19 = vld [vmem:[%s1855_s7 + $0x8] sm:$0xff]  }
 0x25a   : > { %962 = vmax.xlane.f32.xlu0 %v961_v21  ;;  %1481 = vmatpush3.bf16.msra.mxu0 %v1536_v19 }
 0x25d   : > { %v1065_v22 = vpop.f32.mrb[16].mxu0 }
 0x25e   : > { %v1071_v23 = vmul.f32 0.35355338, %v1065_v22  ;;  %v1470_v24 = vpop.f32.mrb[17].mxu0 }
 0x25f   : > { %v1068_v25 = vpop.f32.mrb[18].mxu0 }
 0x260   : > { %v1471_v26 = vpop.f32.mrb[19].mxu0  ;;  %v1072_v28 = vsel %vm733_vm3, %v1071_v23, -10000.0 }
 0x261   : > { %v1073_v29 = vsel %vm685_vm1, %v1072_v28, -inf }
 0x262   : > { %1074 = vmax.xlane.f32.xlu0 %v1073_v29 }
 0x26d   : > { %v737_v31 = vpop.xlane.xlu0 %736 }
 0x26e   : > { %v738_v32 = vsub.f32 %v734_v6, %v737_v31 }
 0x270   : > { %v739_v33 = vmul.f32 1.442695, %v738_v32 }
 0x272   : > { %1537 = vpow2.f32 %v739_v33 }
 0x27c   : > { %v1538_v34 = vpop.eup %1537 }
 0x27d   : > { %v741_v35 = vsel %vm685_vm1, %v1538_v34, 0.0 }
 0x27e   : > { %742 = vadd.xlane.f32.xlu1 %v741_v35 }
 0x28f   : > { %861 = vrot.lane.b32.xlu1 %v1753_v48, %s1567_s28 }
 0x2df   : > { %v850_v36 = vpop.xlane.xlu1 %849 }
 0x2e0   : > { %v851_v37 = vsub.f32 %v847_v13, %v850_v36 }
 0x2e2   : > { %v852_v38 = vmul.f32 1.442695, %v851_v37  ;;  %v1222_v37 = vand.u32 127, %v551_v30 }
 0x2e4   : > { %1539 = vpow2.f32 %v852_v38  ;;  %v1373_v38 = vld [vmem:[%s1856_s8] ss:$0 sm:$0xff]  ;;  %vm1223_vm7 = vcmp.lt.s32.totalorder %v1222_v37, 32 }
 0x2e7   : > { %v963_v39 = vpop.xlane.xlu0 %962 }
 0x2e8   : > { %v964_v40 = vsub.f32 %v960_v20, %v963_v39 }
 0x2ea   : > { %v965_v41 = vmul.f32 1.442695, %v964_v40 }
 0x2ec   : > { %1541 = vpow2.f32 %v965_v41 }
 0x2ee   : > { %v1540_v42 = vpop.eup %1539 }
 0x2ef   : > { %v1075_v43 = vpop.xlane.xlu0 %1074  ;;  %v854_v44 = vsel %vm685_vm1, %v1540_v42, 0.0 }
 0x2f0   : > { %v1076_v45 = vsub.f32 %v1072_v28, %v1075_v43  ;;  %855 = vadd.xlane.f32.xlu0 %v854_v44  ;;  %v1377_v43 = vsel %vm1223_vm7, 1.0, %v1563_v2 }
 0x2f2   : > { %v1077_v46 = vmul.f32 1.442695, %v1076_v45 }
 0x2f4   : > { %1543 = vpow2.f32 %v1077_v46 }
 0x2f6   : > { %v1542_v47 = vpop.eup %1541 }
 0x2f7   : > { %v967_v49 = vsel %vm685_vm1, %v1542_v47, 0.0 }
 0x2f8   : > { %968 = vadd.xlane.f32.xlu1 %v967_v49 }
 0x2fe   : > { %v1544_v50 = vpop.eup %1543 }
 0x2ff   : > { %v1079_v51 = vsel %vm685_vm1, %v1544_v50, 0.0 }
 0x300   : > { %1080 = vadd.xlane.f32.xlu0 %v1079_v51 }
 0x309   : > { %1085 = vrot.lane.b32.xlu1 %v1753_v48, %s1568_s29 }
 0x30b   : > { %v743_v52 = vpop.xlane.xlu1 %742 }
 0x30c   : > { %1545 = vrcp.f32 %v743_v52 }
 0x30f   : > { %v862_v55 = vpop.permute.xlu1 %861 }
 0x310   : > { %v867_v57 = vsel %vm750_vm2, %v862_v55, 0 }
 0x316   : > { %v1546_v53 = vpop.eup %1545  ;;  %973 = vrot.lane.b32.xlu0 %v1753_v48, %s1566_s27 }
 0x317   : > { %v745_v54 = vmul.f32 %v1546_v53, %v1538_v34 }
 0x319   : > { %v746_v56 = vpack.c.bf16 %v745_v54, %v745_v54 }
 0x31b   : > { %1439 = vmatmul.mubr.msk.bf16.vlgmr.msra.gmra.mrb[4].mxu1 %vm685_vm1, %v746_v56  ;;  %v1379_v56 = vld [vmem:[%s1858_s10] ss:$0 sm:$0xff] }
 0x31c   : > { %1449 = vmatpush3.bf16.msra.mxu1 %v867_v57  ;;  %1450 = vmatprep.mubr.msk.bf16.mxu1 %vm1565_vm0, %v1563_v2 }
 0x31d   : > { %1460 = vmatprep.subr.bf16.mxu1 %v1563_v2 }
 0x37d   : > { %v856_v58 = vpop.xlane.xlu0 %855 }
 0x37e   : > { %1547 = vrcp.f32 %v856_v58 }
 0x385   : > { %v969_v59 = vpop.xlane.xlu1 %968 }
 0x386   : > { %1549 = vrcp.f32 %v969_v59 }
 0x388   : > { %v1548_v60 = vpop.eup %1547 }
 0x389   : > { %v858_v61 = vmul.f32 %v1548_v60, %v1540_v42  ;;  %v1086_v4 = vpop.permute.xlu1 %1085 }
 0x38a   : > { %v1091_v6 = vsel %vm750_vm2, %v1086_v4, 0 }
 0x38b   : > { %v859_v48 = vpack.c.bf16 %v858_v61, %v858_v61 }
 0x38d   : > { %1451 = vmatmul.mubr.msk.bf16.vlgmr.msra.gmra.mrb[8].mxu1 %vm685_vm1, %v859_v48  ;;  %v1081_v62 = vpop.xlane.xlu0 %1080 }
 0x38e   : > { %1551 = vrcp.f32 %v1081_v62  ;;  %1462 = vmatprep.mubr.msk.bf16.mxu1 %vm1565_vm0, %v1563_v2 }
 0x390   : > { %v1550_v63 = vpop.eup %1549 }
 0x391   : > { %v971_v0 = vmul.f32 %v1550_v63, %v1542_v47  ;;  %v974_v1 = vpop.permute.xlu0 %973 }
 0x392   : > { %v979_v3 = vsel %vm750_vm2, %v974_v1, 0 }
 0x393   : > { %1461 = vmatpush3.bf16.msra.mxu1 %v979_v3  ;;  %v972_v5 = vpack.c.bf16 %v971_v0, %v971_v0 }
 0x394   : > { %1472 = vmatprep.subr.bf16.mxu1 %v1563_v2 }
 0x396   : > { %1463 = vmatmul.mubr.msk.bf16.vlgmr.msra.gmra.mrb[12].mxu1 %vm685_vm1, %v972_v5 }
 0x397   : > { %1473 = vmatpush3.bf16.msra.mxu1 %v1091_v6  ;;  %1474 = vmatprep.mubr.msk.bf16.mxu1 %vm1565_vm0, %v1563_v2  ;;  %v1378_v2 = vld [vmem:[%s1857_s9] ss:$0 sm:$0xff] }
 0x398   : > { %v1552_v7 = vpop.eup %1551 }
 0x399   : > { %v1083_v8 = vmul.f32 %v1552_v7, %v1544_v50 }
 0x39b   : > { %v1084_v9 = vpack.c.bf16 %v1083_v8, %v1083_v8 }
 0x39e   : > { %1475 = vmatmul.mubr.msk.bf16.vlgmr.msra.gmra.mrb[16].mxu1 %vm685_vm1, %v1084_v9 }
 0x3ee   : > { %v788_v10 = vpop.f32.mrb[4].mxu1 }
 0x3ef   : > { %v1440_v11 = vpop.f32.mrb[5].mxu1 }
 0x3f0   : > { %v791_v12 = vpop.f32.mrb[6].mxu1 }
 0x3f1   : > { %v1441_v13 = vpop.f32.mrb[7].mxu1 }
 0x460   : > { %v903_v15 = vpop.f32.mrb[8].mxu1 }
 0x461   : > { %1134 = vrot.lane.b32.xlu1 %v903_v15, %s1569_s15  ;;  %v1452_v16 = vpop.f32.mrb[9].mxu1 }
 0x462   : > { %v906_v17 = vpop.f32.mrb[10].mxu1 }
 0x463   : > { %v1453_v18 = vpop.f32.mrb[11].mxu1 }
 0x469   : > { %v1015_v20 = vpop.f32.mrb[12].mxu1 }
 0x46a   : > { %1138 = vrot.lane.b32.xlu0 %v1015_v20, %s1570_s20  ;;  %v1464_v21 = vpop.f32.mrb[13].mxu1 }
 0x46b   : > { %v1018_v22 = vpop.f32.mrb[14].mxu1 }
 0x46c   : > { %v1465_v23 = vpop.f32.mrb[15].mxu1 }
 0x471   : > { %v1127_v24 = vpop.f32.mrb[16].mxu1 }
 0x472   : > { %1142 = vrot.lane.b32.xlu1 %v1127_v24, %s1571_s21  ;;  %v1476_v25 = vpop.f32.mrb[17].mxu1 }
 0x473   : > { %v1130_v26 = vpop.f32.mrb[18].mxu1 }
 0x474   : > { %v1477_v28 = vpop.f32.mrb[19].mxu1 }
 0x4d3   : > { %v1135_v29 = vpop.permute.xlu1 %1134 }
 0x4d4   : > { %v1145_v32 = vsel %vm685_vm1, %v788_v10, %v1135_v29 }
 0x4dc   : > { %v1139_v31 = vpop.permute.xlu0 %1138 }
 0x4dd   : > { %v1147_v33 = vsel %vm1146_vm4, %v1145_v32, %v1139_v31 }
 0x4e4   : > { %v1143_v34 = vpop.permute.xlu1 %1142 }
 0x4e5   : > { %v1149_v35 = vsel %vm1148_vm5, %v1147_v33, %v1143_v34 }
 0x4e6   : > { %v1150_v36 = vpack.c.bf16 %v1149_v35, %v1149_v35 }
 0x4e8   : > { %1483 = vmatmul.mubr.msk.bf16.vlgmr.msra.gmra.mrb[20].mxu0 %vm1174_vm6, %v1150_v36 }
 0x5bb   : > { %v1212_v39 = vpop.f32.mrb[20].mxu0 }
 0x5bc   : > { %v1213_v40 = vadd.f32 %v1373_v38, %v1212_v39  ;;  %v1484_v41 = vpop.f32.mrb[21].mxu0 }
 0x5bd   : > { %v1215_v42 = vpop.f32.mrb[22].mxu0 }
 0x5be   : > { %v1218_v44 = vadd.f32 %v1213_v40, %v1735_v27  ;;  %v1485_v45 = vpop.f32.mrb[23].mxu0 }
 0x5c0   : > { %v1226_v46 = vmul.f32 %v1377_v43, %v1218_v44 }
 0x5c2   : > { %1227 = vadd.xlane.f32.xlu0 %v1226_v46 }
 0x64f   : > { %v1228_v47 = vpop.xlane.xlu0 %1227 }
 0x650   : > { %v1229_v49 = vmul.f32 0.03125, %v1228_v47 }
 0x652   : > { %v1230_v30 = vsub.f32 %v1218_v44, %v1229_v49 }
 0x654   : > { %v1231_v50 = vmul.f32 %v1377_v43, %v1230_v30 }
 0x656   : > { %v1232_v51 = vmul.f32 %v1231_v50, %v1231_v50 }
 0x658   : > { %1233 = vadd.xlane.f32.xlu1 %v1232_v51 }
 0x6e5   : > { %v1234_v52 = vpop.xlane.xlu1 %1233 }
 0x6e6   : > { %v1235_v53 = vmul.f32 0.03125, %v1234_v52 }
 0x6e8   : > { %v1236_v54 = vadd.f32 1e-12, %v1235_v53 }
 0x6ea   : > { %1553 = vrsqrt.f32 %v1236_v54 }
 0x6f4   : > { %v1554_v55 = vpop.eup %1553 }
 0x6f5   : > { %v1238_v27 = vmul.f32 %v1554_v55, %v1230_v30 }
 0x6f7   : > { %v1245_v57 = vmul.f32 %v1378_v2, %v1238_v27 }
 0x6f9   : > { %v1252_v58 = vadd.f32 %v1379_v56, %v1245_v57 }
 0x6fb   : > { %1253 = vst [vmem:[%s415_s18] sm:$0xff] %v1252_v58 }
 0x6fc PF: > { %s21_s17 = sadd.s32 1, %s1561_s17  }
 0x6fd   : > { %p18_p4 = scmp.ge.s32.totalorder %s21_s17, 4  }
 0x6ff   :  { %20 = sbr.rel (!%p18_p4) target bundleno = 1 (0x1), region = 100 }

</bundles_post_ra>
